<compile_context>
chip_gen: v7x
topology: tpu7x:2x2x1
jax: 0.10.0
libtpu: 0.0.40
codegen_flags: <defaults>
</compile_context>

<pallas_src>
import typing as _typing

import jax
import jax.numpy as jnp
from jax.experimental import pallas as pl
from jax.experimental.pallas import tpu as pltpu

BN_EPS = 1e-5
LANE = 128          # feature-axis padding (lane width)
TILE_ROWS = 256     # node-axis tile (matches 256-wide MXU on v6e/v7x; fine on v5e)


def _round_up(n: int, m: int) -> int:
    return ((n + m - 1) // m) * m


def _apply_act(h, act_name: str):
    if act_name == "leaky_relu":
        return jnp.where(h >= 0, h, 0.01 * h)
    elif act_name == "relu":
        return jnp.maximum(h, 0.0)
    elif act_name == "elu":
        # expm1 on the clamped negative part: exact ELU, no inf in the untaken branch.
        return jnp.where(h >= 0, h, jnp.expm1(jnp.minimum(h, 0.0)))
    elif act_name == "tanh":
        return jnp.tanh(h)
    else:
        # TODO(synk): 'prelu' has a learnable slope parameter; fall back to ReLU like the module default.
        return jnp.maximum(h, 0.0)


def _make_fused_gin_kernel(act_name: str, eps: float, n_mlp: int,
                           n_true: int, n_pad: int, d_pad: int, tile: int):
    """Kernel for grid (num_layers, num_row_tiles), tile axis innermost.

    Ref order: x, adj, W_stack(bf16), b_stack, gamma_stack, beta_stack, out, h_prev, h_new
      h_prev : (n_pad, d_pad) f32 scratch — post-BN features of the previous layer
               (initialized from x at the first grid step).
      h_new  : (n_pad, d_pad) f32 scratch — pre-BN features of the current layer.
    """
    n_tiles = n_pad // tile

    def kernel(x_ref, adj_ref, w_ref, b_ref, g_ref, bt_ref, out_ref, h_prev, h_new):
        l = pl.program_id(0)
        t = pl.program_id(1)

        # Seed the resident feature scratch with the (padded) input features.
        @pl.when(jnp.logical_and(l == 0, t == 0))
        def _init():
            h_prev[...] = x_ref[...]

        row0 = pl.multiple_of(t * tile, tile)

        # --- GIN aggregation for this row tile (bf16 MXU, f32 accumulation) ---
        adj_t = adj_ref[...]                                    # (tile, n_pad) bf16
        h_all = h_prev[...]                                     # (n_pad, d_pad) f32
        agg = jnp.dot(adj_t, h_all.astype(jnp.bfloat16),
                      preferred_element_type=jnp.float32)       # (tile, d_pad) f32
        h_self = h_prev[pl.ds(row0, tile), :]
        if eps == 0.0:
            h = h_self + agg                                    # drop the (1+eps) multiply
        else:
            h = (1.0 + eps) * h_self + agg

        # --- MLP: Linear, then (act, Linear) x (mlp_layers - 1), bf16 MXU / f32 acc ---
        for m in range(n_mlp):
            if m > 0:
                h = _apply_act(h, act_name)
            w = w_ref[m]                                        # (d_pad, d_pad) bf16
            b = b_ref[m]                                        # (1, d_pad) f32
            h = jnp.dot(h.astype(jnp.bfloat16), w,
                        preferred_element_type=jnp.float32) + b

        # --- outer activation ---
        h = _apply_act(h, act_name)

        # Stash pre-BN rows for this tile.
        h_new[pl.ds(row0, tile), :] = h

        # --- BatchNorm finalize on the layer's last tile (two-pass statistics) ---
        @pl.when(t == n_tiles - 1)
        def _finalize():
            hp = h_new[...]                                     # (n_pad, d_pad) f32
            if n_pad != n_true:
                # Padded rows hold bias-derived values after the Linear; mask them
                # out of the batch statistics and keep inv_n = 1 / true N.
                row_mask = (jax.lax.broadcasted_iota(jnp.int32, (n_pad, 1), 0)
                            < n_true).astype(jnp.float32)
                hm = hp * row_mask
            else:
                row_mask = None
                hm = hp
            inv_n = 1.0 / float(n_true)
            mean = jnp.sum(hm, axis=0, keepdims=True) * inv_n
            centered = hp - mean
            if row_mask is not None:
                centered = centered * row_mask
            var = jnp.sum(centered * centered, axis=0, keepdims=True) * inv_n
            gamma = g_ref[0]                                    # (1, d_pad)
            beta = bt_ref[0]                                    # (1, d_pad)
            scale = gamma * jax.lax.rsqrt(var + BN_EPS)         # rsqrt -> EUP slot
            shift = beta - mean * scale
            h_out = hp * scale + shift
            h_prev[...] = h_out                                 # feeds the next layer
            out_ref[0] = h_out                                  # written back when l changes

    return kernel


class GINPallas:
    """JAX/Pallas re-implementation of AutoGL `_GIN` (forward only).

    TODO(synk): _dropout is accepted but the reference forward never applies dropout;
    BatchNorm running statistics are not persisted (forward-only).
    """

    def __init__(
        self,
        input_dimension: int,
        dimensions: _typing.Sequence[int],
        _act: str,
        _dropout: float,
        mlp_layers: int,
        _eps: str,
        *,
        key=None,
    ):
        self._act = _act
        self._eps = 0.0  # GINConv initial eps; train_eps only controls learnability
        self._n_mlp = int(mlp_layers)
        if key is None:
            key = jax.random.PRNGKey(0)

        self.true_in = int(input_dimension)
        self.true_dims = [int(d) for d in dimensions]
        self.num_layers = len(self.true_dims)
        # Unified padded feature width so a single (layer, tile) grid can stream
        # stacked, identically-shaped per-layer parameters.
        self.d_pad = max(_round_up(self.true_in, LANE),
                         max(_round_up(d, LANE) for d in self.true_dims))

        L, n_mlp, Dp = self.num_layers, self._n_mlp, self.d_pad
        w_host = jnp.zeros((L * n_mlp, Dp, Dp), jnp.float32)
        b_host = jnp.zeros((L * n_mlp, 1, Dp), jnp.float32)
        gamma = jnp.zeros((L, 1, Dp), jnp.float32)
        beta = jnp.zeros((L, 1, Dp), jnp.float32)

        dims_in = [self.true_in] + self.true_dims[:-1]
        for l, (d_in, d_out) in enumerate(zip(dims_in, self.true_dims)):
            for m in range(n_mlp):
                fan_in = d_in if m == 0 else d_out
                key, kw, kb = jax.random.split(key, 3)
                w = jax.random.normal(kw, (fan_in, d_out), jnp.float32) * 0.1
                bb = jax.random.normal(kb, (d_out,), jnp.float32) * 0.1
                # Zero padding keeps padded feature columns exactly zero end to end.
                w_host = w_host.at[l * n_mlp + m, :fan_in, :d_out].set(w)
                b_host = b_host.at[l * n_mlp + m, 0, :d_out].set(bb)
            gamma = gamma.at[l, 0, :d_out].set(1.0)   # BN weight init
        # Weights pre-cast to bf16 on the host: bf16 MXU path + half the weight DMA bytes.
        self.w_stack = w_host.astype(jnp.bfloat16)
        self.b_stack = b_host
        self.gamma_stack = gamma
        self.beta_stack = beta

    def _vmem_limit(self, n_pad: int, tile: int) -> int:
        Dp, n_mlp = self.d_pad, self._n_mlp
        resident = (
            2 * tile * n_pad * 2            # adj tile double-buffer (bf16)
            + 2 * n_pad * Dp * 4            # x block
            + 2 * n_mlp * Dp * Dp * 2       # weight block (bf16)
            + 2 * n_mlp * Dp * 4            # bias block
            + 4 * Dp * 4                    # gamma/beta blocks
            + 2 * n_pad * Dp * 4            # output block
            + 2 * n_pad * Dp * 4            # h_prev + h_new scratch
            + n_pad * Dp * 2                # live bf16 copy of h for the aggregation
            + 16 * tile * Dp * 4            # misc per-tile temporaries
        )
        want = int(1.5 * resident) + (4 << 20)
        try:
            cap_phys = int(pltpu.get_tpu_info().vmem_capacity_bytes)
        except Exception:
            cap_phys = 64 << 20             # conservative (v7x per-TC VMEM)
        ceiling = int(cap_phys * 0.80)      # ~51 MiB on v7x, ~102 MiB on v5e/v6e
        return max(min(want, ceiling), 32 << 20)

    def __call__(self, x, edge_index):
        num_nodes, in_dim = x.shape
        assert in_dim == self.true_in
        L, n_mlp, Dp = self.num_layers, self._n_mlp, self.d_pad

        tile = TILE_ROWS
        n_pad = _round_up(max(num_nodes, 1), tile)
        n_tiles = n_pad // tile

        # Dense adjacency built directly in bf16: adj[dst, src] = edge multiplicity
        # (small integers are exact in bf16). Padded rows/cols stay zero.
        src, dst = edge_index[0], edge_index[1]
        adj = jnp.zeros((n_pad, n_pad), jnp.bfloat16).at[dst, src].add(
            jnp.ones(src.shape, jnp.bfloat16))

        # Lane-dense, row-padded node features at the unified width.
        x_p = jnp.zeros((n_pad, Dp), jnp.float32).at[:num_nodes, :in_dim].set(x)

        kernel = _make_fused_gin_kernel(self._act, self._eps, n_mlp,
                                        num_nodes, n_pad, Dp, tile)

        grid_spec = pltpu.PrefetchScalarGridSpec(
            num_scalar_prefetch=0,
            grid=(L, n_tiles),                                   # tile axis innermost
            in_specs=[
                pl.BlockSpec((n_pad, Dp), lambda l, t: (0, 0)),          # x (resident)
                pl.BlockSpec((tile, n_pad), lambda l, t: (t, 0)),        # adj row tiles (pipelined)
                pl.BlockSpec((n_mlp, Dp, Dp), lambda l, t: (l, 0, 0)),   # per-layer weights
                pl.BlockSpec((n_mlp, 1, Dp), lambda l, t: (l, 0, 0)),    # per-layer biases
                pl.BlockSpec((1, 1, Dp), lambda l, t: (l, 0, 0)),        # gamma
                pl.BlockSpec((1, 1, Dp), lambda l, t: (l, 0, 0)),        # beta
            ],
            out_specs=pl.BlockSpec((1, n_pad, Dp), lambda l, t: (l, 0, 0)),
            scratch_shapes=[
                pltpu.VMEM((n_pad, Dp), jnp.float32),   # h_prev (layer input, post-BN)
                pltpu.VMEM((n_pad, Dp), jnp.float32),   # h_new  (layer output, pre-BN)
            ],
        )

        # --- cost estimate (matmul flops dominate) ---
        flops = L * (2 * n_pad * n_pad * Dp
                     + n_mlp * 2 * n_pad * Dp * Dp
                     + 12 * n_pad * Dp)
        transcendentals = L * n_mlp * n_pad * Dp if self._act in ("tanh", "elu") else 0
        bytes_accessed = (L * n_pad * n_pad * 2          # adjacency streamed once per layer
                          + n_pad * Dp * 4               # x
                          + L * n_mlp * Dp * Dp * 2      # weights
                          + L * n_mlp * Dp * 4           # biases
                          + 2 * L * Dp * 4               # gamma/beta
                          + L * n_pad * Dp * 4)          # outputs

        out = pl.pallas_call(
            kernel,
            out_shape=jax.ShapeDtypeStruct((L, n_pad, Dp), jnp.float32),
            grid_spec=grid_spec,
            compiler_params=pltpu.CompilerParams(
                # Both axes carry sequential dependencies through the h scratch.
                dimension_semantics=("arbitrary", "arbitrary"),
                vmem_limit_bytes=self._vmem_limit(n_pad, tile),
            ),
            cost_estimate=pl.CostEstimate(
                flops=int(flops),
                transcendentals=int(transcendentals),
                bytes_accessed=int(bytes_accessed),
            ),
        )(x_p, adj, self.w_stack, self.b_stack, self.gamma_stack, self.beta_stack)

        results = [x]
        for l, d in enumerate(self.true_dims):
            results.append(out[l, :num_nodes, :d])   # strip row/lane padding (plain XLA slice)
        return results


if __name__ == "__main__":
    key = jax.random.PRNGKey(0)
    k_x, k_e, k_p = jax.random.split(key, 3)

    num_nodes = 16
    input_dim = 16
    dimensions = [32, 32]
    mlp_layers = 2

    # Node features.
    x = jax.random.normal(k_x, (num_nodes, input_dim), jnp.float32)

    # Deterministic edge_index: ring graph (both directions) + a few random edges.
    ring_src = jnp.arange(num_nodes)
    ring_dst = (ring_src + 1) % num_nodes
    rand_src = jax.random.randint(k_e, (8,), 0, num_nodes)
    rand_dst = jax.random.randint(jax.random.fold_in(k_e, 1), (8,), 0, num_nodes)
    edge_index = jnp.stack(
        [
            jnp.concatenate([ring_src, ring_dst, rand_src]),
            jnp.concatenate([ring_dst, ring_src, rand_dst]),
        ],
        axis=0,
    ).astype(jnp.int32)

    model = GINPallas(
        input_dimension=input_dim,
        dimensions=dimensions,
        _act="relu",
        _dropout=0.0,
        mlp_layers=mlp_layers,
        _eps="False",
        key=k_p,
    )

    results = model(x, edge_index)
    results = [jax.block_until_ready(r) for r in results]

    assert len(results) == len(dimensions) + 1
    assert results[0].shape == (num_nodes, input_dim)
    for i, d in enumerate(dimensions):
        assert results[i + 1].shape == (num_nodes, d)
        assert bool(jnp.all(jnp.isfinite(results[i + 1])))

    print("KERNEL_OK")
</pallas_src>

<mosaic_0001>
module attributes {stable_mosaic.version = 11 : i64} {
  func.func @kernel(%arg0: i32, %arg1: i32, %arg2: memref<256x128xf32, #tpu.memory_space<vmem>>, %arg3: memref<256x256xbf16, #tpu.memory_space<vmem>>, %arg4: memref<2x128x128xbf16, #tpu.memory_space<vmem>>, %arg5: memref<2x1x128xf32, #tpu.memory_space<vmem>>, %arg6: memref<1x1x128xf32, #tpu.memory_space<vmem>>, %arg7: memref<1x1x128xf32, #tpu.memory_space<vmem>>, %arg8: memref<1x256x128xf32, #tpu.memory_space<vmem>>, %arg9: memref<256x128xf32, #tpu.memory_space<vmem>>, %arg10: memref<256x128xf32, #tpu.memory_space<vmem>>) attributes {dimension_semantics = [#tpu.dimension_semantics<arbitrary>, #tpu.dimension_semantics<arbitrary>], iteration_bounds = array<i64: 2, 1>, scalar_prefetch = 0 : i64, scratch_operands = 2 : i64, tpu.core_type = #tpu.core_type<tc>, window_params = [{pipeline_mode = #tpu.pipeline_mode<synchronous>, transform_indices = @transform_0, window_bounds = array<i64: 256, 128>}, {transform_indices = @transform_1, window_bounds = array<i64: 256, 256>}, {transform_indices = @transform_2, window_bounds = array<i64: 2, 128, 128>}, {transform_indices = @transform_3, window_bounds = array<i64: 2, 1, 128>}, {transform_indices = @transform_4, window_bounds = array<i64: 1, 1, 128>}, {transform_indices = @transform_5, window_bounds = array<i64: 1, 1, 128>}, {transform_indices = @transform_6, window_bounds = array<i64: 1, 256, 128>}]} {
    %c0_i32 = arith.constant 0 : i32
    %0 = arith.cmpi eq, %arg0, %c0_i32 : i32
    %c0_i32_0 = arith.constant 0 : i32
    %1 = arith.cmpi eq, %arg1, %c0_i32_0 : i32
    %2 = arith.andi %0, %1 : i1
    %3 = arith.extui %2 : i1 to i32
    %c0_i32_1 = arith.constant 0 : i32
    %4 = arith.cmpi ne, %3, %c0_i32_1 : i32
    scf.if %4 {
      %c0_24 = arith.constant 0 : index
      %c0_25 = arith.constant 0 : index
      %39 = vector.load %arg2[%c0_24, %c0_25] : memref<256x128xf32, #tpu.memory_space<vmem>>, vector<256x128xf32>
      %c0_26 = arith.constant 0 : index
      %c0_27 = arith.constant 0 : index
      %40 = vector.load %arg9[%c0_26, %c0_27] : memref<256x128xf32, #tpu.memory_space<vmem>>, vector<256x128xf32>
      tpu.vector_store %arg9[%c0_26, %c0_27], %39 {strides = array<i32>} : memref<256x128xf32, #tpu.memory_space<vmem>>, vector<256x128xf32>,
    } else {
    }
    %c256_i32 = arith.constant 256 : i32
    %5 = arith.muli %arg1, %c256_i32 : i32
    %6 = tpu.assume_multiple %5, 256 : i32
    %c0 = arith.constant 0 : index
    %c0_2 = arith.constant 0 : index
    %7 = vector.load %arg3[%c0, %c0_2] : memref<256x256xbf16, #tpu.memory_space<vmem>>, vector<256x256xbf16>
    %c0_3 = arith.constant 0 : index
    %c0_4 = arith.constant 0 : index
    %8 = vector.load %arg9[%c0_3, %c0_4] : memref<256x128xf32, #tpu.memory_space<vmem>>, vector<256x128xf32>
    %9 = arith.truncf %8 : vector<256x128xf32> to vector<256x128xbf16>
    %cst = arith.constant dense<0.000000e+00> : vector<256x128xf32>
    %10 = tpu.matmul %7, %9, %cst {dimension_numbers = #tpu.dot_dimension_numbers<[1], [0], [0], [1], [0, 0, 1, 1], [], []>} : vector<256x256xbf16>, vector<256x128xbf16>, vector<256x128xf32> -> vector<256x128xf32>
    %11 = arith.index_cast %6 : i32 to index
    %c0_5 = arith.constant 0 : index
    %12 = vector.load %arg9[%11, %c0_5] : memref<256x128xf32, #tpu.memory_space<vmem>>, vector<256x128xf32>
    %13 = arith.addf %12, %10 : vector<256x128xf32>
    %c0_6 = arith.constant 0 : index
    %c0_7 = arith.constant 0 : index
    %c0_8 = arith.constant 0 : index
    %14 = vector.load %arg4[%c0_6, %c0_7, %c0_8] : memref<2x128x128xbf16, #tpu.memory_space<vmem>>, vector<1x128x128xbf16>
    %15 = vector.shape_cast %14 : vector<1x128x128xbf16> to vector<128x128xbf16>
    %c0_9 = arith.constant 0 : index
    %c0_10 = arith.constant 0 : index
    %c0_11 = arith.constant 0 : index
    %16 = vector.load %arg5[%c0_9, %c0_10, %c0_11] : memref<2x1x128xf32, #tpu.memory_space<vmem>>, vector<1x1x128xf32>
    %17 = vector.shape_cast %16 : vector<1x1x128xf32> to vector<1x128xf32>
    %18 = arith.truncf %13 : vector<256x128xf32> to vector<256x128xbf16>
    %cst_12 = arith.constant dense<0.000000e+00> : vector<256x128xf32>
    %19 = tpu.matmul %18, %15, %cst_12 {dimension_numbers = #tpu.dot_dimension_numbers<[1], [0], [0], [1], [0, 0, 1, 1], [], []>} : vector<256x128xbf16>, vector<128x128xbf16>, vector<256x128xf32> -> vector<256x128xf32>
    %20 = vector.broadcast %17 : vector<1x128xf32> to vector<256x128xf32>
    %21 = arith.addf %19, %20 : vector<256x128xf32>
    %cst_13 = arith.constant 0.000000e+00 : f32
    %22 = vector.broadcast %cst_13 : f32 to vector<256x128xf32>
    %23 = arith.maximumf %21, %22 : vector<256x128xf32>
    %c1 = arith.constant 1 : index
    %c0_14 = arith.constant 0 : index
    %c0_15 = arith.constant 0 : index
    %24 = vector.load %arg4[%c1, %c0_14, %c0_15] : memref<2x128x128xbf16, #tpu.memory_space<vmem>>, vector<1x128x128xbf16>
    %25 = vector.shape_cast %24 : vector<1x128x128xbf16> to vector<128x128xbf16>
    %c1_16 = arith.constant 1 : index
    %c0_17 = arith.constant 0 : index
    %c0_18 = arith.constant 0 : index
    %26 = vector.load %arg5[%c1_16, %c0_17, %c0_18] : memref<2x1x128xf32, #tpu.memory_space<vmem>>, vector<1x1x128xf32>
    %27 = vector.shape_cast %26 : vector<1x1x128xf32> to vector<1x128xf32>
    %28 = arith.truncf %23 : vector<256x128xf32> to vector<256x128xbf16>
    %cst_19 = arith.constant dense<0.000000e+00> : vector<256x128xf32>
    %29 = tpu.matmul %28, %25, %cst_19 {dimension_numbers = #tpu.dot_dimension_numbers<[1], [0], [0], [1], [0, 0, 1, 1], [], []>} : vector<256x128xbf16>, vector<128x128xbf16>, vector<256x128xf32> -> vector<256x128xf32>
    %30 = vector.broadcast %27 : vector<1x128xf32> to vector<256x128xf32>
    %31 = arith.addf %29, %30 : vector<256x128xf32>
    %cst_20 = arith.constant 0.000000e+00 : f32
    %32 = vector.broadcast %cst_20 : f32 to vector<256x128xf32>
    %33 = arith.maximumf %31, %32 : vector<256x128xf32>
    %34 = arith.index_cast %6 : i32 to index
    %c0_21 = arith.constant 0 : index
    %35 = vector.load %arg10[%34, %c0_21] : memref<256x128xf32, #tpu.memory_space<vmem>>, vector<256x128xf32>
    tpu.vector_store %arg10[%34, %c0_21], %33 {strides = array<i32>} : memref<256x128xf32, #tpu.memory_space<vmem>>, vector<256x128xf32>,
    %c0_i32_22 = arith.constant 0 : i32
    %36 = arith.cmpi eq, %arg1, %c0_i32_22 : i32
    %37 = arith.extui %36 : i1 to i32
    %c0_i32_23 = arith.constant 0 : i32
    %38 = arith.cmpi ne, %37, %c0_i32_23 : i32
    scf.if %38 {
      %c0_24 = arith.constant 0 : index
      %c0_25 = arith.constant 0 : index
      %39 = vector.load %arg10[%c0_24, %c0_25] : memref<256x128xf32, #tpu.memory_space<vmem>>, vector<256x128xf32>
      %40 = tpu.iota {dimensions = array<i32: 0>} : vector<256x1xi32>
      %c16_i32 = arith.constant 16 : i32
      %41 = vector.broadcast %c16_i32 : i32 to vector<256x1xi32>
      %42 = arith.cmpi slt, %40, %41 : vector<256x1xi32>
      %43 = arith.extui %42 : vector<256x1xi1> to vector<256x1xi32>
      %44 = arith.sitofp %43 : vector<256x1xi32> to vector<256x1xf32>
      %45 = vector.broadcast %44 : vector<256x1xf32> to vector<256x128xf32>
      %46 = arith.mulf %39, %45 : vector<256x128xf32>
      %cst_26 = arith.constant dense<0.000000e+00> : vector<128xf32>
      %47 = vector.multi_reduction <add>, %46, %cst_26 [0] : vector<256x128xf32> to vector<128xf32>
      %48 = vector.shape_cast %47 : vector<128xf32> to vector<1x128xf32>
      %cst_27 = arith.constant 6.250000e-02 : f32
      %49 = vector.broadcast %cst_27 : f32 to vector<1x128xf32>
      %50 = arith.mulf %48, %49 : vector<1x128xf32>
      %51 = vector.broadcast %50 : vector<1x128xf32> to vector<256x128xf32>
      %52 = arith.subf %39, %51 : vector<256x128xf32>
      %53 = vector.broadcast %44 : vector<256x1xf32> to vector<256x128xf32>
      %54 = arith.mulf %52, %53 : vector<256x128xf32>
      %55 = arith.mulf %54, %54 : vector<256x128xf32>
      %cst_28 = arith.constant dense<0.000000e+00> : vector<128xf32>
      %56 = vector.multi_reduction <add>, %55, %cst_28 [0] : vector<256x128xf32> to vector<128xf32>
      %57 = vector.shape_cast %56 : vector<128xf32> to vector<1x128xf32>
      %cst_29 = arith.constant 6.250000e-02 : f32
      %58 = vector.broadcast %cst_29 : f32 to vector<1x128xf32>
      %59 = arith.mulf %57, %58 : vector<1x128xf32>
      %c0_30 = arith.constant 0 : index
      %c0_31 = arith.constant 0 : index
      %c0_32 = arith.constant 0 : index
      %60 = vector.load %arg6[%c0_30, %c0_31, %c0_32] : memref<1x1x128xf32, #tpu.memory_space<vmem>>, vector<1x1x128xf32>
      %61 = vector.shape_cast %60 : vector<1x1x128xf32> to vector<1x128xf32>
      %c0_33 = arith.constant 0 : index
      %c0_34 = arith.constant 0 : index
      %c0_35 = arith.constant 0 : index
      %62 = vector.load %arg7[%c0_33, %c0_34, %c0_35] : memref<1x1x128xf32, #tpu.memory_space<vmem>>, vector<1x1x128xf32>
      %63 = vector.shape_cast %62 : vector<1x1x128xf32> to vector<1x128xf32>
      %cst_36 = arith.constant 9.99999974E-6 : f32
      %64 = vector.broadcast %cst_36 : f32 to vector<1x128xf32>
      %65 = arith.addf %59, %64 : vector<1x128xf32>
      %66 = math.rsqrt %65 : vector<1x128xf32>
      %67 = arith.mulf %61, %66 : vector<1x128xf32>
      %68 = arith.mulf %50, %67 : vector<1x128xf32>
      %69 = arith.subf %63, %68 : vector<1x128xf32>
      %70 = vector.broadcast %67 : vector<1x128xf32> to vector<256x128xf32>
      %71 = arith.mulf %39, %70 : vector<256x128xf32>
      %72 = vector.broadcast %69 : vector<1x128xf32> to vector<256x128xf32>
      %73 = arith.addf %71, %72 : vector<256x128xf32>
      %c0_37 = arith.constant 0 : index
      %c0_38 = arith.constant 0 : index
      %74 = vector.load %arg9[%c0_37, %c0_38] : memref<256x128xf32, #tpu.memory_space<vmem>>, vector<256x128xf32>
      tpu.vector_store %arg9[%c0_37, %c0_38], %73 {strides = array<i32>} : memref<256x128xf32, #tpu.memory_space<vmem>>, vector<256x128xf32>,
      %c0_39 = arith.constant 0 : index
      %c0_40 = arith.constant 0 : index
      %c0_41 = arith.constant 0 : index
      %75 = vector.load %arg8[%c0_39, %c0_40, %c0_41] : memref<1x256x128xf32, #tpu.memory_space<vmem>>, vector<1x256x128xf32>
      %76 = vector.shape_cast %75 : vector<1x256x128xf32> to vector<256x128xf32>
      %77 = vector.shape_cast %73 : vector<256x128xf32> to vector<1x256x128xf32>
      tpu.vector_store %arg8[%c0_39, %c0_40, %c0_41], %77 {strides = array<i32>} : memref<1x256x128xf32, #tpu.memory_space<vmem>>, vector<1x256x128xf32>,
    } else {
    }
    return
  }
  func.func @transform_0(%arg0: i32, %arg1: i32) -> (i32, i32) {
    %c0_i32 = arith.constant 0 : i32
    %c0_i32_0 = arith.constant 0 : i32
    %c0_i32_1 = arith.constant 0 : i32
    return %c0_i32, %c0_i32_0 : i32, i32
  }
  func.func @transform_1(%arg0: i32, %arg1: i32) -> (i32, i32) {
    %c0_i32 = arith.constant 0 : i32
    %c0_i32_0 = arith.constant 0 : i32
    return %arg1, %c0_i32 : i32, i32
  }
  func.func @transform_2(%arg0: i32, %arg1: i32) -> (i32, i32, i32) {
    %c0_i32 = arith.constant 0 : i32
    %c0_i32_0 = arith.constant 0 : i32
    %c0_i32_1 = arith.constant 0 : i32
    return %arg0, %c0_i32, %c0_i32_0 : i32, i32, i32
  }
  func.func @transform_3(%arg0: i32, %arg1: i32) -> (i32, i32, i32) {
    %c0_i32 = arith.constant 0 : i32
    %c0_i32_0 = arith.constant 0 : i32
    %c0_i32_1 = arith.constant 0 : i32
    return %arg0, %c0_i32, %c0_i32_0 : i32, i32, i32
  }
  func.func @transform_4(%arg0: i32, %arg1: i32) -> (i32, i32, i32) {
    %c0_i32 = arith.constant 0 : i32
    %c0_i32_0 = arith.constant 0 : i32
    %c0_i32_1 = arith.constant 0 : i32
    return %arg0, %c0_i32, %c0_i32_0 : i32, i32, i32
  }
  func.func @transform_5(%arg0: i32, %arg1: i32) -> (i32, i32, i32) {
    %c0_i32 = arith.constant 0 : i32
    %c0_i32_0 = arith.constant 0 : i32
    %c0_i32_1 = arith.constant 0 : i32
    return %arg0, %c0_i32, %c0_i32_0 : i32, i32, i32
  }
  func.func @transform_6(%arg0: i32, %arg1: i32) -> (i32, i32, i32) {
    %c0_i32 = arith.constant 0 : i32
    %c0_i32_0 = arith.constant 0 : i32
    %c0_i32_1 = arith.constant 0 : i32
    return %arg0, %c0_i32, %c0_i32_0 : i32, i32, i32
  }
}

</mosaic_0001>

<bundles_post_ra>
// kernel: tpu_custom_call.1
= control target key start
LH: loop header
LB: loop body
LE: loop exit
PB: predicated region body
PF: predicated region fallthrough
CT: control target
= control target key end

     0   :  { %11 = vsyncpa [#allocation5], 0  ;;  %s3680_s0 = inlined_call_operand.hbm [shape: f32[256,128], index: 0, kind: input, shape index: {}]   ;;  %s3681_s1 = inlined_call_operand.hbm [shape: bf16[256,256], index: 1, kind: input, shape index: {}]   ;;  %s3682_s2 = inlined_call_operand.hbm [shape: bf16[4,128,128], index: 2, kind: input, shape index: {}]   ;;  %s3683_s3 = inlined_call_operand.vmem [shape: f32[4,1,128], index: 3, kind: input, shape index: {}]   ;;  %s3684_s4 = inlined_call_operand.vmem [shape: f32[2,1,128], index: 4, kind: input, shape index: {}]   ;;  %s3685_s5 = inlined_call_operand.vmem [shape: f32[2,1,128], index: 5, kind: input, shape index: {}]   ;;  %s3686_s6 = inlined_call_operand.hbm [shape: f32[2,256,128], index: 6, kind: output, shape index: {}]  }
   0x1   :  { %12 = vsyncpa [#allocation8], 0 }
   0x2   :  { %13 = vsyncpa [#allocation6], 0 }
   0x3   :  { %15 = vsyncpa [#allocation6 + $0x1], 0  ;;  %s2890_s21 = smov 0   ;;  %s2892_s22 = smov 0  }
   0x4   :  { %s2894_s23 = smov 0   ;;  %s2896_s24 = smov 0  }
   0x5   :  { %s2898_s25 = smov 0   ;;  %s2900_s26 = smov 0  }
   0x6 LB: > { %3692 = sst [smem:[#allocation15_spill]] %s2823_s21  ;;  %s2921_s27 = sadd.s32 4294967295, %s2843_s26   ;;  %s2843_s26 = sphi %s2900_s26, %s21_s26   ;;  %s2839_s25 = sphi %s2898_s25, %s3716_s25   ;;  %s2835_s24 = sphi %s2896_s24, %s3715_s24   ;;  %s2831_s23 = sphi %s2894_s23, %s3714_s23   ;;  %s2827_s22 = sphi %s2892_s22, %s3713_s22   ;;  %s2823_s21 = sphi %s2890_s21, %s3712_s21  }
   0x7   : > { %s2164_s28 = sadd.s32 4294967294, %s2843_s26   ;;  %p94_p0 = scmp.ne.s32.totalorder %s2831_s23, %s2827_s22 }
   0x8   : > { %p95_p1 = scmp.eq.s32.totalorder %s2843_s26, 0  ;;  %p100_p2 = scmp.ne.s32.totalorder %s2827_s22, %s2823_s21 }
   0x9   : > { %p3687_p3 = scmp.eq.s32.totalorder %s2921_s27, 0  ;;  %p202_p5 = scmp.eq.s32.totalorder %s2921_s27, 1 }
   0xa   : > { %p2930_p4 = por %p95_p1, %p94_p0  ;;  %p208_p7 = scmp.eq.s32.totalorder %s2164_s28, 1 }
   0xb   : > { %p2937_p6 = por %p3687_p3, %p100_p2  ;;  %p2941_p8 = por %p202_p5, %p94_p0 }
   0xc   : > { %p2165_p9 = scmp.ge.s32.totalorder %s2843_s26, 1  ;;  %p2946_p10 = por %p208_p7, %p100_p2 }
   0xd   : > { %s3694_s30 = scalar_select %p2937_p6, 1, 0 }
   0xe   : > { %s3695_s7 = scalar_select %p2941_p8, 1, 0 }
   0xf   : > { %s3696_s8 = scalar_select %p2946_p10, 1, 0 }
  0x10   : > { %p215_p11 = scmp.lt.s32.totalorder %s2843_s26, 3  ;;  %s2845_s10 = smov [#allocation4]  }
  0x11   : > { %3697 = sst [smem:[#allocation16_spill]] %s3696_s8  ;;  %s227_s11 = sshll.u32 %s2845_s10, 4  ;;  %s2955_s11 = int_to_ptr.vmem [resolvable:$true] %s227_s11 }
  0x12   : > { %p2951_p12 = pnand %p2165_p9, %p215_p11  ;;  %p2541_p1 = scmp.lt.s32.totalorder %s2843_s26, 2 }
  0x13   : > { %s2846_s14 = smov [#allocation7]   ;;  %s2667_s18 = scalar_lea.hbm %s3680_s0, 4096 }
  0x14   : > { %p2524_p13 = pneg %p2951_p12  ;;  %p2969_p2 = pnand %p2541_p1, %p2930_p4 }
  0x15   : > { %s244_s15 = sshll.u32 %s2846_s14, 4  ;;  %p2668_p7 = scmp.ne.s32.totalorder %s3680_s0, %s2667_s18  ;;  %s2973_s15 = int_to_ptr.vmem [resolvable:$true] %s244_s15 }
  0x16   : > { %p2963_p5 = pnand %p2524_p13, %p3687_p3  ;;  %p2674_p13 = scmp.lt.u32.totalorder %s2667_s18, %s3680_s0 }
  0x18   : > { %p2669_p9 = pneg %p2963_p5 }
  0x1a   : > { %p2670_p4 = pnand %p2669_p9, %p2668_p7 }
  0x1c   : > { %p2671_p11 = pneg %p2670_p4 }
  0x1e   : > { %p2676_p1 = pnand %p2674_p13, %p2671_p11 }
  0x20   : > { %2679 = shalt.err (!%p2676_p1)
}
  0x21   : > { %s2680_s10 = scalar_lea.vmem %s2955_s11, 4096  ;;  %p2688_p8 = scmp.lt.s32.totalorder %s2955_s11, %s2955_s11 }
  0x22   : > { %p2681_p0 = scmp.ne.s32.totalorder %s2955_s11, %s2680_s10  ;;  %p2689_p7 = scmp.lt.s32.totalorder %s2680_s10, %s2680_s10 }
  0x24   : > { %p2683_p3 = pnand %p2681_p0, %p2669_p9  ;;  %p2690_p4 = por %p2689_p7, %p2688_p8 }
  0x26   : > { %p2684_p10 = pneg %p2683_p3 }
  0x28   : > { %p2691_p6 = pnand %p2690_p4, %p2684_p10 }
  0x2a   : > { %2694 = shalt.err (!%p2691_p6)
}
  0x2b   : > { %s2847_s14 = smov 128   ;;  %s2848_s16 = smov 8  }
  0x2c   : > { %2527 = dma.hbm_to_vmem [thread:$0]  (!%p2963_p5), %s3680_s0, 4096, %s2955_s11, [#allocation5], %s2847_s14, %s2847_s14, %s2848_s16  }
  0x2d   : > { %s2695_s28 = scalar_lea.hbm %s3681_s1, 4096 }
  0x2e   : > { %p2696_p3 = scmp.ne.s32.totalorder %s3681_s1, %s2695_s28  ;;  %p2702_p10 = scmp.lt.u32.totalorder %s2695_s28, %s3681_s1 }
  0x30   : > { %p2698_p6 = pnand %p2696_p3, %p2669_p9 }
  0x32   : > { %p2699_p8 = pneg %p2698_p6 }
  0x34   : > { %p2704_p0 = pnand %p2702_p10, %p2699_p8 }
  0x36   : > { %2707 = shalt.err (!%p2704_p0)
}
  0x37   : > { %s2708_s11 = scalar_lea.vmem %s2973_s15, 4096  ;;  %p2716_p7 = scmp.lt.s32.totalorder %s2973_s15, %s2973_s15 }
  0x38   : > { %p2709_p11 = scmp.ne.s32.totalorder %s2973_s15, %s2708_s11  ;;  %p2717_p4 = scmp.lt.s32.totalorder %s2708_s11, %s2708_s11 }
  0x3a   : > { %p2711_p13 = pnand %p2709_p11, %p2669_p9  ;;  %p2718_p3 = por %p2717_p4, %p2716_p7 }
  0x3c   : > { %p2712_p1 = pneg %p2711_p13 }
  0x3e   : > { %p2719_p6 = pnand %p2718_p3, %p2712_p1 }
  0x40   : > { %2722 = shalt.err (!%p2719_p6)
}
  0x41   : > { %2530 = dma.hbm_to_vmem [thread:$0]  (!%p2963_p5), %s3681_s1, 4096, %s2973_s15, [#allocation8], %s2847_s14, %s2847_s14, %s2848_s16  }
  0x42   : > { %s87_s17 = sadd.s32 1, %s2831_s23  ;;  %s33_s18 = sadd.s32 1, %s2839_s25 }
  0x43   : > { %s258_s19 = sand.u32 1, %s2843_s26   ;;  %p35_p9 = scmp.ge.s32.totalorder %s33_s18, 2 }
  0x44   : > { %s260_s20 = sand.u32 1, %s2831_s23   ;;  %s2253_s12 = sshll.u32 %s2839_s25, 11 }
  0x45   : > { %s3718_s18 = smov (%p35_p9, %s33_s18), 0  ;;  %s2169_s28 = sshll.u32 %s260_s20, 7 }
  0x46   : > { %s3037_s11 = scalar_lea.hbm %s3682_s2, %s2253_s12  ;;  %s84_s15 = ssub.s32 %s2839_s25, %s3718_s18 }
  0x47   : > { %p85_p5 = scmp.eq.s32.totalorder %s84_s15, 0  ;;  %s262_s14 = scalar_lea.vmem [#allocation9], %s2169_s28 }
  0x48   : > { %s270_s16 = sshll.u32 %s262_s14, 4  ;;  %s3046_s8 = scalar_lea.sflag [#allocation5], %s258_s19  ;;  %s3041_s16 = int_to_ptr.vmem [resolvable:$true] %s270_s16 }
  0x49   : > { %s3044_s21 = scalar_select %p85_p5, %s2831_s23, %s87_s17  }
  0x4a   : > { %s2723_s20 = scalar_lea.hbm %s3037_s11, 2048  ;;  %p2725_p10 = pneg %p2969_p2 }
  0x4b   : > { %p2724_p8 = scmp.ne.s32.totalorder %s3037_s11, %s2723_s20  ;;  %s2728_s10 = scalar_lea.hbm %s3682_s2, 4096 }
  0x4c   : > { %p2729_p13 = scmp.lt.u32.totalorder %s3037_s11, %s3682_s2  ;;  %p2730_p1 = scmp.lt.u32.totalorder %s2728_s10, %s2723_s20 }
  0x4d   : > { %p2726_p0 = pnand %p2725_p10, %p2724_p8  ;;  %p2732_p4 = scmp.lt.u32.totalorder %s2723_s20, %s3037_s11 }
  0x4e   : > { %p2731_p7 = por %p2730_p1, %p2729_p13 }
  0x4f   : > { %p2727_p11 = pneg %p2726_p0 }
  0x50   : > { %p2733_p3 = por %p2732_p4, %p2731_p7 }
  0x52   : > { %p2734_p6 = pnand %p2733_p3, %p2727_p11 }
  0x54   : > { %2737 = shalt.err (!%p2734_p6)
}
  0x55   : > { %s2738_s17 = scalar_lea.vmem %s3041_s16, 2048  ;;  %s2849_s19 = smov [#allocation9]  }
  0x56   : > { %p2739_p9 = scmp.ne.s32.totalorder %s3041_s16, %s2738_s17  ;;  %s2743_s14 = sshll.u32 %s2849_s19, 4  ;;  %s2744_s14 = int_to_ptr.vmem [resolvable:$false] %s2743_s14 }
  0x57   : > { %s2745_s12 = scalar_lea.vmem %s2744_s14, 4096  ;;  %p2746_p0 = scmp.lt.s32.totalorder %s3041_s16, %s2744_s14 }
  0x58   : > { %p2741_p5 = pnand %p2739_p9, %p2725_p10  ;;  %p2747_p13 = scmp.lt.s32.totalorder %s2745_s12, %s2738_s17 }
  0x5a   : > { %p2742_p8 = pneg %p2741_p5  ;;  %p2748_p1 = por %p2747_p13, %p2746_p0 }
  0x5c   : > { %p2749_p7 = pnand %p2748_p1, %p2742_p8 }
  0x5e   : > { %2752 = shalt.err (!%p2749_p7)
}
  0x5f   : > { %s2850_s20 = smov 64   ;;  %s2851_s29 = smov 4  }
  0x60   : > { %2534 = dma.hbm_to_vmem [thread:$0]  (!%p2969_p2), %s3037_s11, 2048, %s3041_s16, %s3046_s8, %s2850_s20, %s2850_s20, %s2851_s29  }
  0x61   : > { %302 = sbr.rel (%p2951_p12) target bundleno = 1126 (0x466), region = 44  ;;  %p3701_p10 = scmp.eq.s32.totalorder (!%p2951_p12), %s2921_s27, 0 }
  0x68   : > { %2806 = dma.done.wait (%p3701_p10), [#allocation5], 4096   ;;  %p3702_p11 = pmov %p3701_p10 }
  0x69   : > { %p3703_p4 = pmov %p3701_p10 }
  0x6a   : > { %2808 = vsyncadd (%p3702_p11), [#allocation5], 4294963200 }
  0x6b   : > { %2810 = dma.done.wait (%p3703_p4), [#allocation8], 4096   ;;  %p3704_p3 = pmov %p3703_p4 }
  0x6c   : > { %s312_s13 = sand.u32 1, %s2921_s27   ;;  %s3086_s11 = sand.u32 1, %s2827_s22  }
  0x6d   : > { %2812 = vsyncadd (%p3704_p3), [#allocation8], 4294963200  ;;  %s2176_s9 = sshll.u32 %s3086_s11, 7  ;;  %s313_s16 = scalar_lea.sflag [#allocation5], %s312_s13 }
  0x6e   : > { %s3089_s8 = scalar_lea.vmem [#allocation9], %s2176_s9  ;;  %p3705_p12 = scmp.ne.s32.totalorder %s3694_s30, 0 }
  0x70   : > { %2814 = dma.done.wait (%p3705_p12), %s313_s16, 2048  }
  0x71   : > { %2816 = vsyncadd (%p3705_p12), %s313_s16, 4294965248  ;;  %s2177_s10 = sshll.u32 %s3086_s11, 8  ;;  %s2178_s28 = sshll.u32 %s2835_s24, 1 }
  0x72   : > { %p358_p2 = scmp.lt.s32.totalorder %s2178_s28, 3  ;;  %p362_p6 = scmp.lt.s32.totalorder %s2835_s24, 1 }
  0x73   : > { %p369_p9 = scmp.eq.s32.totalorder %s2835_s24, 0  ;;  %s3115_s9 = scalar_lea.vmem [#allocation10], %s2177_s10 }
  0x74   : > { %s3720_s28 = smov (!%p358_p2, %s2178_s28), 3  ;;  %v375_v0 = vld [vmem:[#allocation4] sm:$0xff] (%p369_p9)  ;;  %v376_v1 = vld [vmem:[#allocation4 + $0x8] sm:$0xff] (%p369_p9)  ;;  %v377_v2 = vld [vmem:[#allocation4 + $0x10] sm:$0xff] (%p369_p9) }
  0x75   : > { %s3100_s27 = scalar_select %p362_p6, %s2835_s24, 1 }
  0x76   : > { %s3105_s30 = scalar_lea.vmem %s3683_s3, %s3720_s28  ;;  %374 = sbr.rel (!%p369_p9) target bundleno = 134 (0x86), region = 60  ;;  %407 = vst [vmem:[#allocation2] sm:$0xff] (%p369_p9), %v375_v0  ;;  %408 = vst [vmem:[#allocation2 + $0x8] sm:$0xff] (%p369_p9), %v376_v1  ;;  %v378_v3 = vld [vmem:[#allocation4 + $0x18] sm:$0xff] (%p369_p9)  ;;  %v379_v4 = vld [vmem:[#allocation4 + $0x20] sm:$0xff] (%p369_p9) }
  0x77   : > { %s364_s12 = scalar_lea.vmem %s3684_s4, %s3100_s27  ;;  %s367_s13 = scalar_lea.vmem %s3685_s5, %s3100_s27  ;;  %409 = vst [vmem:[#allocation2 + $0x10] sm:$0xff] (%p369_p9), %v377_v2  ;;  %v380_v5 = vld [vmem:[#allocation4 + $0x28] sm:$0xff] (%p369_p9)  ;;  %410 = vst [vmem:[#allocation2 + $0x18] sm:$0xff] (%p369_p9), %v378_v3  ;;  %v381_v6 = vld [vmem:[#allocation4 + $0x30] sm:$0xff] (%p369_p9) }
  0x78   : > { %411 = vst [vmem:[#allocation2 + $0x20] sm:$0xff] (%p369_p9), %v379_v4  ;;  %412 = vst [vmem:[#allocation2 + $0x28] sm:$0xff] (%p369_p9), %v380_v5  ;;  %v382_v7 = vld [vmem:[#allocation4 + $0x38] sm:$0xff] (%p369_p9)  ;;  %v383_v8 = vld [vmem:[#allocation4 + $0x40] sm:$0xff] (%p369_p9) }
  0x79   : > { %413 = vst [vmem:[#allocation2 + $0x30] sm:$0xff] (%p369_p9), %v381_v6  ;;  %414 = vst [vmem:[#allocation2 + $0x38] sm:$0xff] (%p369_p9), %v382_v7  ;;  %v384_v9 = vld [vmem:[#allocation4 + $0x48] sm:$0xff] (%p369_p9)  ;;  %v385_v10 = vld [vmem:[#allocation4 + $0x50] sm:$0xff] (%p369_p9) }
  0x7a   : > { %415 = vst [vmem:[#allocation2 + $0x40] sm:$0xff] (%p369_p9), %v383_v8  ;;  %v386_v11 = vld [vmem:[#allocation4 + $0x58] sm:$0xff] (%p369_p9)  ;;  %416 = vst [vmem:[#allocation2 + $0x48] sm:$0xff] (%p369_p9), %v384_v9  ;;  %v387_v12 = vld [vmem:[#allocation4 + $0x60] sm:$0xff] (%p369_p9) }
  0x7b   : > { %417 = vst [vmem:[#allocation2 + $0x50] sm:$0xff] (%p369_p9), %v385_v10  ;;  %418 = vst [vmem:[#allocation2 + $0x58] sm:$0xff] (%p369_p9), %v386_v11  ;;  %v388_v13 = vld [vmem:[#allocation4 + $0x68] sm:$0xff] (%p369_p9)  ;;  %v389_v14 = vld [vmem:[#allocation4 + $0x70] sm:$0xff] (%p369_p9) }
  0x7c   : > { %419 = vst [vmem:[#allocation2 + $0x60] sm:$0xff] (%p369_p9), %v387_v12  ;;  %420 = vst [vmem:[#allocation2 + $0x68] sm:$0xff] (%p369_p9), %v388_v13  ;;  %v390_v15 = vld [vmem:[#allocation4 + $0x78] sm:$0xff] (%p369_p9)  ;;  %v391_v16 = vld [vmem:[#allocation4 + $0x80] sm:$0xff] (%p369_p9) }
  0x7d   : > { %421 = vst [vmem:[#allocation2 + $0x70] sm:$0xff] %v389_v14  ;;  %v392_v17 = vld [vmem:[#allocation4 + $0x88] sm:$0xff]  ;;  %422 = vst [vmem:[#allocation2 + $0x78] sm:$0xff] %v390_v15  ;;  %v393_v18 = vld [vmem:[#allocation4 + $0x90] sm:$0xff] }
  0x7e   : > { %423 = vst [vmem:[#allocation2 + $0x80] sm:$0xff] %v391_v16  ;;  %424 = vst [vmem:[#allocation2 + $0x88] sm:$0xff] %v392_v17  ;;  %v394_v19 = vld [vmem:[#allocation4 + $0x98] sm:$0xff]  ;;  %v395_v20 = vld [vmem:[#allocation4 + $0xa0] sm:$0xff] }
  0x7f   : > { %425 = vst [vmem:[#allocation2 + $0x90] sm:$0xff] %v393_v18  ;;  %426 = vst [vmem:[#allocation2 + $0x98] sm:$0xff] %v394_v19  ;;  %v396_v21 = vld [vmem:[#allocation4 + $0xa8] sm:$0xff]  ;;  %v397_v22 = vld [vmem:[#allocation4 + $0xb0] sm:$0xff] }
  0x80   : > { %427 = vst [vmem:[#allocation2 + $0xa0] sm:$0xff] %v395_v20  ;;  %v398_v23 = vld [vmem:[#allocation4 + $0xb8] sm:$0xff]  ;;  %428 = vst [vmem:[#allocation2 + $0xa8] sm:$0xff] %v396_v21  ;;  %v399_v24 = vld [vmem:[#allocation4 + $0xc0] sm:$0xff] }
  0x81   : > { %429 = vst [vmem:[#allocation2 + $0xb0] sm:$0xff] %v397_v22  ;;  %430 = vst [vmem:[#allocation2 + $0xb8] sm:$0xff] %v398_v23  ;;  %v400_v25 = vld [vmem:[#allocation4 + $0xc8] sm:$0xff]  ;;  %v401_v26 = vld [vmem:[#allocation4 + $0xd0] sm:$0xff] }
  0x82   : > { %431 = vst [vmem:[#allocation2 + $0xc0] sm:$0xff] %v399_v24  ;;  %432 = vst [vmem:[#allocation2 + $0xc8] sm:$0xff] %v400_v25  ;;  %v402_v27 = vld [vmem:[#allocation4 + $0xd8] sm:$0xff]  ;;  %v403_v28 = vld [vmem:[#allocation4 + $0xe0] sm:$0xff] }
  0x83   : > { %433 = vst [vmem:[#allocation2 + $0xd0] sm:$0xff] %v401_v26  ;;  %v404_v29 = vld [vmem:[#allocation4 + $0xe8] sm:$0xff]  ;;  %434 = vst [vmem:[#allocation2 + $0xd8] sm:$0xff] %v402_v27  ;;  %v405_v30 = vld [vmem:[#allocation4 + $0xf0] sm:$0xff] }
  0x84   : > { %435 = vst [vmem:[#allocation2 + $0xe0] sm:$0xff] %v403_v28  ;;  %436 = vst [vmem:[#allocation2 + $0xe8] sm:$0xff] %v404_v29  ;;  %v406_v31 = vld [vmem:[#allocation4 + $0xf8] sm:$0xff] }
  0x85   : > { %437 = vst [vmem:[#allocation2 + $0xf0] sm:$0xff] %v405_v30  ;;  %438 = vst [vmem:[#allocation2 + $0xf8] sm:$0xff] %v406_v31 }
  0x86 PF: > { %v3117_v32 = vld [vmem:[#allocation2 + $0x80] sm:$0xff]  ;;  %v3119_v33 = vld [vmem:[#allocation2 + $0x88] sm:$0xff]  ;;  %v3127_v37 = vld [vmem:[#allocation2 + $0x90] sm:$0xff]  ;;  %s2255_s27 = sshll.u32 %s2835_s24, 12  ;;  %s2030_s15 = sshll.u32 %s3115_s9, 4  ;;  %s3617_s15 = int_to_ptr.vmem [resolvable:$true] %s2030_s15 }
  0x87   : > { %v3121_v34 = vld [vmem:[#allocation2] sm:$0xff]  ;;  %v512_v35 = vpack.c.bf16 %v3119_v33, %v3117_v32  ;;  %v3125_v36 = vld [vmem:[#allocation2 + $0x8] sm:$0xff]  ;;  %v3129_v38 = vld [vmem:[#allocation2 + $0x98] sm:$0xff]  ;;  %s3613_s19 = scalar_lea.hbm %s3686_s6, %s2255_s27  ;;  %s2017_s24 = scalar_lea.sflag [#allocation6], %s3086_s11 }
  0x88   : > { %v504_v39 = vpack.c.bf16 %v3125_v36, %v3121_v34  ;;  %v513_v40 = vpack.c.bf16 %v3129_v38, %v3127_v37  ;;  %v3135_v41 = vld [vmem:[#allocation2 + $0x10] sm:$0xff]  ;;  %v3137_v42 = vld [vmem:[#allocation2 + $0x18] sm:$0xff]  ;;  %v3139_v43 = vld [vmem:[#allocation2 + $0xa0] sm:$0xff]  ;;  %s2753_s14 = scalar_lea.vmem %s3617_s15, 4096  ;;  %p3706_p8 = scmp.ne.s32.totalorder %s3695_s7, 0 }
  0x89   : > { %2256 = vmatprep.subr.bf16.mxu0 %v512_v35  ;;  %v3141_v44 = vld [vmem:[#allocation2 + $0xa8] sm:$0xff]  ;;  %v505_v45 = vpack.c.bf16 %v3137_v42, %v3135_v41  ;;  %v3147_v47 = vld [vmem:[#allocation2 + $0x20] sm:$0xff]  ;;  %v3151_v49 = vld [vmem:[#allocation2 + $0xb0] sm:$0xff]  ;;  %p2754_p5 = scmp.ne.s32.totalorder %s3617_s15, %s2753_s14 }
  0x8a   : > { %2257 = vmatpush3.bf16.msra.mxu0 %v504_v39  ;;  %v514_v46 = vpack.c.bf16 %v3141_v44, %v3139_v43  ;;  %v3149_v48 = vld [vmem:[#allocation2 + $0x28] sm:$0xff]  ;;  %v3153_v50 = vld [vmem:[#allocation2 + $0xb8] sm:$0xff]  ;;  %v3159_v53 = vld [vmem:[#allocation2 + $0x30] sm:$0xff] }
  0x8b   : > { %2258 = vmatprep.subr.bf16.mxu0 %v513_v40  ;;  %v506_v51 = vpack.c.bf16 %v3149_v48, %v3147_v47  ;;  %v515_v52 = vpack.c.bf16 %v3153_v50, %v3151_v49  ;;  %v3161_v54 = vld [vmem:[#allocation2 + $0x38] sm:$0xff]  ;;  %v3163_v55 = vld [vmem:[#allocation2 + $0xc0] sm:$0xff]  ;;  %v3165_v56 = vld [vmem:[#allocation2 + $0xc8] sm:$0xff]  ;;  %p2755_p0 = pnand %p2754_p5, %p3706_p8 }
  0x8c   : > { %v2603_v57 = vld [vmem:[#allocation7 + $0x4] ss:$8 sps:$4 sm:$0xff]   ;;  %v507_v58 = vpack.c.bf16 %v3161_v54, %v3159_v53  ;;  %v516_v60 = vpack.c.bf16 %v3165_v56, %v3163_v55  ;;  %v3175_v62 = vld [vmem:[#allocation2 + $0xd0] sm:$0xff]  ;;  %v3177_v63 = vld [vmem:[#allocation2 + $0xd8] sm:$0xff] }
  0x8d   : > { %v3169_v59 = vld [vmem:[#allocation2 + $0x40] sm:$0xff]  ;;  %v3173_v61 = vld [vmem:[#allocation2 + $0x48] sm:$0xff]  ;;  %712 = vmatprep.mubr.bf16.mxu0 %v2603_v57  ;;  %v3181_v1 = vld [vmem:[#allocation2 + $0x50] sm:$0xff]  ;;  %v517_v2 = vpack.c.bf16 %v3177_v63, %v3175_v62  ;;  %p2756_p13 = pneg %p2755_p0 }
  0x8e   : > { %2259 = vmatpush3.bf16.msra.mxu0 %v505_v45  ;;  %v508_v0 = vpack.c.bf16 %v3173_v61, %v3169_v59  ;;  %v3185_v3 = vld [vmem:[#allocation2 + $0x58] sm:$0xff]  ;;  %v3187_v4 = vld [vmem:[#allocation2 + $0xe0] sm:$0xff]  ;;  %v3189_v5 = vld [vmem:[#allocation2 + $0xe8] sm:$0xff] }
  0x8f   : > { %2260 = vmatprep.subr.bf16.mxu0 %v514_v46  ;;  %v509_v6 = vpack.c.bf16 %v3185_v3, %v3181_v1  ;;  %v3193_v7 = vld [vmem:[#allocation2 + $0x60] sm:$0xff]  ;;  %v518_v8 = vpack.c.bf16 %v3189_v5, %v3187_v4  ;;  %v3197_v9 = vld [vmem:[#allocation2 + $0x68] sm:$0xff]  ;;  %v3199_v10 = vld [vmem:[#allocation2 + $0xf0] sm:$0xff] }
  0x90   : > { %v3201_v11 = vld [vmem:[#allocation2 + $0xf8] sm:$0xff]  ;;  %v510_v12 = vpack.c.bf16 %v3197_v9, %v3193_v7  ;;  %v3205_v13 = vld [vmem:[#allocation2 + $0x70] sm:$0xff]  ;;  %v2601_v17 = vld [vmem:[#allocation7] ss:$8 sps:$4 sm:$0xff]  }
  0x91   : > { %v519_v14 = vpack.c.bf16 %v3201_v11, %v3199_v10  ;;  %v3209_v15 = vld [vmem:[#allocation2 + $0x78] sm:$0xff]  ;;  %v2649_v19 = vld [vmem:[%s3089_s8] sm:$0xff]   ;;  %v2650_v20 = vld [vmem:[%s3089_s8 + $0x8] sm:$0xff]  }
  0x92   : > { %2261 = vmatpush3.bf16.msra.mxu0 %v506_v51  ;;  %v511_v16 = vpack.c.bf16 %v3209_v15, %v3205_v13  ;;  %v2604_v18 = vld [vmem:[#allocation7 + $0x14] ss:$8 sps:$4 sm:$0xff]   ;;  %2416 = vmatprep.subr.bf16.mxu1 %v2649_v19  ;;  %v2606_v22 = vld [vmem:[#allocation7 + $0x10] ss:$8 sps:$4 sm:$0xff]   ;;  %v2607_v23 = vld [vmem:[#allocation7 + $0x24] ss:$8 sps:$4 sm:$0xff]  }
  0x93   : > { %2262 = vmatprep.subr.bf16.mxu0 %v515_v52  ;;  %2417 = vmatpush3.bf16.msra.mxu1 %v2649_v19  ;;  %v2651_v21 = vld [vmem:[%s3089_s8 + $0x10] sm:$0xff]   ;;  %v2652_v24 = vld [vmem:[%s3089_s8 + $0x18] sm:$0xff]   ;;  %v2609_v25 = vld [vmem:[#allocation7 + $0x20] ss:$8 sps:$4 sm:$0xff]  }
  0x94   : > { %2418 = vmatprep.subr.bf16.mxu1 %v2650_v20  ;;  %v2610_v26 = vld [vmem:[#allocation7 + $0x34] ss:$8 sps:$4 sm:$0xff]   ;;  %v2612_v27 = vld [vmem:[#allocation7 + $0x30] ss:$8 sps:$4 sm:$0xff]   ;;  %v2613_v28 = vld [vmem:[#allocation7 + $0x44] ss:$8 sps:$4 sm:$0xff]  }
  0x95   : > { %v2615_v29 = vld [vmem:[#allocation7 + $0x40] ss:$8 sps:$4 sm:$0xff]   ;;  %v2616_v30 = vld [vmem:[#allocation7 + $0x54] ss:$8 sps:$4 sm:$0xff]   ;;  %v2618_v31 = vld [vmem:[#allocation7 + $0x50] ss:$8 sps:$4 sm:$0xff]  }
  0x96   : > { %2263 = vmatpush3.bf16.msra.mxu0 %v507_v58  ;;  %v2619_v35 = vld [vmem:[#allocation7 + $0x64] ss:$8 sps:$4 sm:$0xff]   ;;  %v2621_v39 = vld [vmem:[#allocation7 + $0x60] ss:$8 sps:$4 sm:$0xff]   ;;  %v2622_v40 = vld [vmem:[#allocation7 + $0x74] ss:$8 sps:$4 sm:$0xff]  }
  0x97   : > { %2264 = vmatprep.subr.bf16.mxu0 %v516_v60  ;;  %2419 = vmatpush3.bf16.msra.mxu1 %v2650_v20  ;;  %v2624_v45 = vld [vmem:[#allocation7 + $0x70] ss:$8 sps:$4 sm:$0xff]   ;;  %v2625_v46 = vld [vmem:[#allocation7 + $0x84] ss:$8 sps:$4 sm:$0xff]   ;;  %v2627_v51 = vld [vmem:[#allocation7 + $0x80] ss:$8 sps:$4 sm:$0xff]  }
  0x98   : > { %2420 = vmatprep.subr.bf16.mxu1 %v2651_v21  ;;  %v2628_v52 = vld [vmem:[#allocation7 + $0x94] ss:$8 sps:$4 sm:$0xff]   ;;  %v2630_v57 = vld [vmem:[#allocation7 + $0x90] ss:$8 sps:$4 sm:$0xff]   ;;  %v2631_v58 = vld [vmem:[#allocation7 + $0xa4] ss:$8 sps:$4 sm:$0xff]  }
  0x99   : > { %v2633_v60 = vld [vmem:[#allocation7 + $0xa0] ss:$8 sps:$4 sm:$0xff]   ;;  %v2642_v19 = vld [vmem:[#allocation7 + $0xd0] ss:$8 sps:$4 sm:$0xff]   ;;  %v2643_v20 = vld [vmem:[#allocation7 + $0xe4] ss:$8 sps:$4 sm:$0xff]  }
  0x9a   : > { %2265 = vmatpush3.bf16.msra.mxu0 %v508_v0  ;;  %v2634_v0 = vld [vmem:[#allocation7 + $0xb4] ss:$8 sps:$4 sm:$0xff]  }
  0x9b   : > { %2266 = vmatprep.subr.bf16.mxu0 %v517_v2  ;;  %2421 = vmatpush3.bf16.msra.mxu1 %v2651_v21  ;;  %v2653_v2 = vld [vmem:[%s3089_s8 + $0x20] sm:$0xff]  }
  0x9c   : > { %2422 = vmatprep.subr.bf16.mxu1 %v2652_v24  ;;  %v2645_v21 = vld [vmem:[#allocation7 + $0xe0] ss:$8 sps:$4 sm:$0xff]  }
  0x9e   : > { %2267 = vmatpush3.bf16.msra.mxu0 %v509_v6  ;;  %v2636_v6 = vld [vmem:[#allocation7 + $0xb0] ss:$8 sps:$4 sm:$0xff]  }
  0x9f   : > { %2268 = vmatprep.subr.bf16.mxu0 %v518_v8  ;;  %2423 = vmatpush3.bf16.msra.mxu1 %v2652_v24  ;;  %v2637_v8 = vld [vmem:[#allocation7 + $0xc4] ss:$8 sps:$4 sm:$0xff]  }
  0xa0   : > { %2424 = vmatprep.subr.bf16.mxu1 %v2653_v2 }
  0xa2   : > { %2269 = vmatpush3.bf16.msra.mxu0 %v510_v12  ;;  %v2654_v12 = vld [vmem:[%s3089_s8 + $0x28] sm:$0xff]  }
  0xa3   : > { %2270 = vmatprep.subr.bf16.mxu0 %v519_v14  ;;  %2425 = vmatpush3.bf16.msra.mxu1 %v2653_v2  ;;  %v2655_v14 = vld [vmem:[%s3089_s8 + $0x30] sm:$0xff]  }
  0xa4   : > { %2426 = vmatprep.subr.bf16.mxu1 %v2654_v12 }
  0xa6   : > { %2271 = vmatpush3.bf16.msra.mxu0 %v511_v16  ;;  %v2639_v16 = vld [vmem:[#allocation7 + $0xc0] ss:$8 sps:$4 sm:$0xff]  }
  0xa7   : > { %2427 = vmatpush3.bf16.msra.mxu1 %v2654_v12 }
  0xa8   : > { %2428 = vmatprep.subr.bf16.mxu1 %v2655_v14 }
  0xa9   : > { %713 = vmatmul.mubr.bf16.vlgmr.msra.gmra.mrb[0].mxu0 %v2601_v17  ;;  %v2640_v17 = vld [vmem:[#allocation7 + $0xd4] ss:$8 sps:$4 sm:$0xff]  }
  0xaa   : > { %720 = vmatprep.mubr.bf16.mxu0 %v2604_v18  ;;  %v2656_v18 = vld [vmem:[%s3089_s8 + $0x38] sm:$0xff]  }
  0xab   : > { %2429 = vmatpush3.bf16.msra.mxu1 %v2655_v14 }
  0xac   : > { %2430 = vmatprep.subr.bf16.mxu1 %v2656_v18 }
  0xaf   : > { %2431 = vmatpush3.bf16.msra.mxu1 %v2656_v18 }
  0xb1   : > { %721 = vmatmul.mubr.bf16.gmra.mrb[4].mxu0 %v2606_v22  ;;  %v2646_v22 = vld [vmem:[#allocation7 + $0xf4] ss:$8 sps:$4 sm:$0xff]  }
  0xb2   : > { %728 = vmatprep.mubr.bf16.mxu0 %v2607_v23  ;;  %v2648_v23 = vld [vmem:[#allocation7 + $0xf0] ss:$8 sps:$4 sm:$0xff]  }
  0xb9   : > { %729 = vmatmul.mubr.bf16.gmra.mrb[8].mxu0 %v2609_v25 }
  0xba   : > { %736 = vmatprep.mubr.bf16.mxu0 %v2610_v26 }
  0xc1   : > { %737 = vmatmul.mubr.bf16.gmra.mrb[12].mxu0 %v2612_v27 }
  0xc2   : > { %744 = vmatprep.mubr.bf16.mxu0 %v2613_v28  ;;  %v2657_v28 = vld [vmem:[%s3089_s8 + $0x40] sm:$0xff]  }
  0xc3   : > { %2464 = vmatprep.subr.bf16.mxu1 %v2657_v28 }
  0xc9   : > { %745 = vmatmul.mubr.bf16.gmra.mrb[16].mxu0 %v2615_v29 }
  0xca   : > { %752 = vmatprep.mubr.bf16.mxu0 %v2616_v30 }
  0xd1   : > { %753 = vmatmul.mubr.bf16.gmra.mrb[20].mxu0 %v2618_v31 }
  0xd2   : > { %760 = vmatprep.mubr.bf16.mxu0 %v2619_v35 }
  0xd9   : > { %761 = vmatmul.mubr.bf16.gmra.mrb[24].mxu0 %v2621_v39 }
  0xda   : > { %768 = vmatprep.mubr.bf16.mxu0 %v2622_v40 }
  0xe1   : > { %769 = vmatmul.mubr.bf16.gmra.mrb[28].mxu0 %v2624_v45 }
  0xe2   : > { %776 = vmatprep.mubr.bf16.mxu0 %v2625_v46 }
  0xe9   : > { %777 = vmatmul.mubr.bf16.gmra.mrb[32].mxu0 %v2627_v51 }
  0xea   : > { %784 = vmatprep.mubr.bf16.mxu0 %v2628_v52 }
  0xf1   : > { %785 = vmatmul.mubr.bf16.gmra.mrb[36].mxu0 %v2630_v57 }
  0xf2   : > { %792 = vmatprep.mubr.bf16.mxu0 %v2631_v58 }
  0xf9   : > { %793 = vmatmul.mubr.bf16.gmra.mrb[40].mxu0 %v2633_v60 }
  0xfa   : > { %800 = vmatprep.mubr.bf16.mxu0 %v2634_v0 }
 0x101   : > { %801 = vmatmul.mubr.bf16.gmra.mrb[44].mxu0 %v2636_v6  ;;  %v2658_v6 = vld [vmem:[%s3089_s8 + $0x48] sm:$0xff]  }
 0x102   : > { %808 = vmatprep.mubr.bf16.mxu0 %v2637_v8 }
 0x109   : > { %809 = vmatmul.mubr.bf16.gmra.mrb[48].mxu0 %v2639_v16  ;;  %v2659_v16 = vld [vmem:[%s3089_s8 + $0x50] sm:$0xff]  }
 0x10a   : > { %816 = vmatprep.mubr.bf16.mxu0 %v2640_v17 }
 0x111   : > { %817 = vmatmul.mubr.bf16.gmra.mrb[52].mxu0 %v2642_v19  ;;  %v2660_v19 = vld [vmem:[%s3089_s8 + $0x58] sm:$0xff]  }
 0x112   : > { %824 = vmatprep.mubr.bf16.mxu0 %v2643_v20 }
 0x119   : > { %825 = vmatmul.mubr.bf16.gmra.mrb[56].mxu0 %v2645_v21 }
 0x11a   : > { %832 = vmatprep.mubr.bf16.mxu0 %v2646_v22 }
 0x121   : > { %833 = vmatmul.mubr.bf16.gmra.mrb[60].mxu0 %v2648_v23 }
 0x17c   : > { %v2272_v24 = vpop.f32.mrb[0].mxu0 }
 0x17d   : > { %v2273_v25 = vpop.f32.mrb[1].mxu0 }
 0x17e   : > { %v2274_v26 = vadd.f32 %v2273_v25, %v2272_v24  ;;  %v2275_v27 = vpop.f32.mrb[2].mxu0  ;;  %v2661_v25 = vld [vmem:[%s3089_s8 + $0x60] sm:$0xff]  }
 0x17f   : > { %v2276_v29 = vpop.f32.mrb[3].mxu0 }
 0x180   : > { %v2277_v30 = vadd.f32 %v2276_v29, %v2275_v27  ;;  %v874_v31 = vadd.f32 %v2274_v26, %v3121_v34 }
 0x182   : > { %v875_v35 = vadd.f32 %v2277_v30, %v3125_v36 }
 0x184   : > { %v2278_v39 = vpop.f32.mrb[4].mxu0  ;;  %v923_v40 = vpack.c.bf16 %v875_v35, %v874_v31 }
 0x185   : > { %v2279_v45 = vpop.f32.mrb[5].mxu0 }
 0x186   : > { %v2280_v46 = vadd.f32 %v2279_v45, %v2278_v39  ;;  %v2281_v51 = vpop.f32.mrb[6].mxu0  ;;  %2432 = vmatprep.mubr.bf16.mxu1 %v923_v40 }
 0x187   : > { %v2282_v52 = vpop.f32.mrb[7].mxu0 }
 0x188   : > { %v2283_v57 = vadd.f32 %v2282_v52, %v2281_v51  ;;  %v876_v58 = vadd.f32 %v2280_v46, %v3135_v41 }
 0x18a   : > { %v877_v60 = vadd.f32 %v2283_v57, %v3137_v42 }
 0x18c   : > { %v2284_v0 = vpop.f32.mrb[8].mxu0  ;;  %v924_v2 = vpack.c.bf16 %v877_v60, %v876_v58 }
 0x18d   : > { %v2285_v34 = vpop.f32.mrb[9].mxu0 }
 0x18e   : > { %v2286_v8 = vadd.f32 %v2285_v34, %v2284_v0  ;;  %v2287_v36 = vpop.f32.mrb[10].mxu0  ;;  %2433 = vmatmul.mubr.bf16.vlgmr.msra.gmra.mrb[0].mxu1 %v924_v2 }
 0x18f   : > { %v2288_v12 = vpop.f32.mrb[11].mxu0  ;;  %2465 = vmatpush3.bf16.msra.mxu1 %v2657_v28  ;;  %v2662_v28 = vld [vmem:[%s3089_s8 + $0x68] sm:$0xff]  }
 0x190   : > { %v2289_v14 = vadd.f32 %v2288_v12, %v2287_v36  ;;  %2466 = vmatprep.subr.bf16.mxu1 %v2658_v6  ;;  %v878_v17 = vadd.f32 %v2286_v8, %v3147_v47 }
 0x192   : > { %v879_v41 = vadd.f32 %v2289_v14, %v3149_v48 }
 0x193   : > { %2467 = vmatpush3.bf16.msra.mxu1 %v2658_v6 }
 0x194   : > { %v2290_v42 = vpop.f32.mrb[12].mxu0  ;;  %v925_v18 = vpack.c.bf16 %v879_v41, %v878_v17  ;;  %2468 = vmatprep.subr.bf16.mxu1 %v2659_v16 }
 0x195   : > { %v2291_v20 = vpop.f32.mrb[13].mxu0 }
 0x196   : > { %v2292_v21 = vadd.f32 %v2291_v20, %v2290_v42  ;;  %v2293_v22 = vpop.f32.mrb[14].mxu0  ;;  %2436 = vmatprep.mubr.bf16.mxu1 %v925_v18 }
 0x197   : > { %v2294_v23 = vpop.f32.mrb[15].mxu0  ;;  %2469 = vmatpush3.bf16.msra.mxu1 %v2659_v16 }
 0x198   : > { %v2295_v24 = vadd.f32 %v2294_v23, %v2293_v22  ;;  %2470 = vmatprep.subr.bf16.mxu1 %v2660_v19  ;;  %v880_v26 = vadd.f32 %v2292_v21, %v3159_v53 }
 0x19a   : > { %v881_v47 = vadd.f32 %v2295_v24, %v3161_v54 }
 0x19b   : > { %2471 = vmatpush3.bf16.msra.mxu1 %v2660_v19 }
 0x19c   : > { %v2296_v48 = vpop.f32.mrb[16].mxu0  ;;  %v926_v27 = vpack.c.bf16 %v881_v47, %v880_v26  ;;  %2472 = vmatprep.subr.bf16.mxu1 %v2661_v25 }
 0x19d   : > { %v2297_v29 = vpop.f32.mrb[17].mxu0 }
 0x19e   : > { %v2298_v30 = vadd.f32 %v2297_v29, %v2296_v48  ;;  %v2299_v31 = vpop.f32.mrb[18].mxu0  ;;  %2437 = vmatmul.mubr.bf16.gmra.mrb[4].mxu1 %v926_v27 }
 0x19f   : > { %v2300_v35 = vpop.f32.mrb[19].mxu0  ;;  %2473 = vmatpush3.bf16.msra.mxu1 %v2661_v25 }
 0x1a0   : > { %v2301_v39 = vadd.f32 %v2300_v35, %v2299_v31  ;;  %2474 = vmatprep.subr.bf16.mxu1 %v2662_v28  ;;  %v882_v40 = vadd.f32 %v2298_v30, %v3169_v59 }
 0x1a2   : > { %v883_v45 = vadd.f32 %v2301_v39, %v3173_v61 }
 0x1a3   : > { %2475 = vmatpush3.bf16.msra.mxu1 %v2662_v28 }
 0x1a4   : > { %v2302_v53 = vpop.f32.mrb[20].mxu0  ;;  %v927_v54 = vpack.c.bf16 %v883_v45, %v882_v40 }
 0x1a5   : > { %v2303_v46 = vpop.f32.mrb[21].mxu0 }
 0x1a6   : > { %v2304_v51 = vadd.f32 %v2303_v46, %v2302_v53  ;;  %v2305_v52 = vpop.f32.mrb[22].mxu0  ;;  %2440 = vmatprep.mubr.bf16.mxu1 %v927_v54 }
 0x1a7   : > { %v2306_v57 = vpop.f32.mrb[23].mxu0 }
 0x1a8   : > { %v2307_v58 = vadd.f32 %v2306_v57, %v2305_v52  ;;  %v884_v60 = vadd.f32 %v2304_v51, %v3181_v1 }
 0x1aa   : > { %v885_v0 = vadd.f32 %v2307_v58, %v3185_v3 }
 0x1ac   : > { %v2308_v2 = vpop.f32.mrb[24].mxu0  ;;  %v928_v6 = vpack.c.bf16 %v885_v0, %v884_v60 }
 0x1ad   : > { %v2309_v34 = vpop.f32.mrb[25].mxu0 }
 0x1ae   : > { %v2310_v8 = vadd.f32 %v2309_v34, %v2308_v2  ;;  %v2311_v59 = vpop.f32.mrb[26].mxu0  ;;  %2441 = vmatmul.mubr.bf16.gmra.mrb[8].mxu1 %v928_v6 }
 0x1af   : > { %v2312_v61 = vpop.f32.mrb[27].mxu0 }
 0x1b0   : > { %v2313_v36 = vadd.f32 %v2312_v61, %v2311_v59  ;;  %v886_v12 = vadd.f32 %v2310_v8, %v3193_v7 }
 0x1b2   : > { %v887_v14 = vadd.f32 %v2313_v36, %v3197_v9 }
 0x1b4   : > { %v2314_v16 = vpop.f32.mrb[28].mxu0  ;;  %v929_v17 = vpack.c.bf16 %v887_v14, %v886_v12 }
 0x1b5   : > { %v2315_v41 = vpop.f32.mrb[29].mxu0 }
 0x1b6   : > { %v2316_v42 = vadd.f32 %v2315_v41, %v2314_v16  ;;  %v2317_v18 = vpop.f32.mrb[30].mxu0  ;;  %2444 = vmatprep.mubr.bf16.mxu1 %v929_v17  ;;  %v2663_v16 = vld [vmem:[%s3089_s8 + $0x70] sm:$0xff]  }
 0x1b7   : > { %v2318_v1 = vpop.f32.mrb[31].mxu0  ;;  %2476 = vmatprep.subr.bf16.mxu1 %v2663_v16 }
 0x1b8   : > { %v2319_v3 = vadd.f32 %v2318_v1, %v2317_v18  ;;  %v888_v19 = vadd.f32 %v2316_v42, %v3205_v13  ;;  %2477 = vmatpush3.bf16.msra.mxu1 %v2663_v16  ;;  %v2664_v18 = vld [vmem:[%s3089_s8 + $0x78] sm:$0xff]  }
 0x1b9   : > { %2478 = vmatprep.subr.bf16.mxu1 %v2664_v18 }
 0x1ba   : > { %v889_v20 = vadd.f32 %v2319_v3, %v3209_v15 }
 0x1bc   : > { %v2320_v21 = vpop.f32.mrb[32].mxu0  ;;  %v930_v22 = vpack.c.bf16 %v889_v20, %v888_v19  ;;  %2479 = vmatpush3.bf16.msra.mxu1 %v2664_v18 }
 0x1bd   : > { %v2321_v23 = vpop.f32.mrb[33].mxu0 }
 0x1be   : > { %v2322_v24 = vadd.f32 %v2321_v23, %v2320_v21  ;;  %v2323_v25 = vpop.f32.mrb[34].mxu0  ;;  %2445 = vmatmul.mubr.bf16.gmra.mrb[12].mxu1 %v930_v22 }
 0x1bf   : > { %v2324_v7 = vpop.f32.mrb[35].mxu0 }
 0x1c0   : > { %v2325_v9 = vadd.f32 %v2324_v7, %v2323_v25  ;;  %v890_v26 = vadd.f32 %v2322_v24, %v3117_v32 }
 0x1c2   : > { %v891_v47 = vadd.f32 %v2325_v9, %v3119_v33 }
 0x1c4   : > { %v2326_v48 = vpop.f32.mrb[36].mxu0  ;;  %v931_v27 = vpack.c.bf16 %v891_v47, %v890_v26 }
 0x1c5   : > { %v2327_v28 = vpop.f32.mrb[37].mxu0 }
 0x1c6   : > { %v2328_v29 = vadd.f32 %v2327_v28, %v2326_v48  ;;  %v2329_v30 = vpop.f32.mrb[38].mxu0  ;;  %2448 = vmatprep.mubr.bf16.mxu1 %v931_v27 }
 0x1c7   : > { %v2330_v13 = vpop.f32.mrb[39].mxu0 }
 0x1c8   : > { %v2331_v15 = vadd.f32 %v2330_v13, %v2329_v30  ;;  %v892_v31 = vadd.f32 %v2328_v29, %v3127_v37 }
 0x1ca   : > { %v893_v35 = vadd.f32 %v2331_v15, %v3129_v38  ;;  %v3262_v15 = vld [vmem:[%s3105_s30] ss:$0 sm:$0xff] }
 0x1cc   : > { %v2332_v39 = vpop.f32.mrb[40].mxu0  ;;  %v932_v40 = vpack.c.bf16 %v893_v35, %v892_v31 }
 0x1cd   : > { %v2333_v45 = vpop.f32.mrb[41].mxu0 }
 0x1ce   : > { %v2334_v53 = vadd.f32 %v2333_v45, %v2332_v39  ;;  %v2335_v54 = vpop.f32.mrb[42].mxu0  ;;  %2449 = vmatmul.mubr.bf16.gmra.mrb[16].mxu1 %v932_v40 }
 0x1cf   : > { %v2336_v32 = vpop.f32.mrb[43].mxu0 }
 0x1d0   : > { %v2337_v33 = vadd.f32 %v2336_v32, %v2335_v54  ;;  %v894_v46 = vadd.f32 %v2334_v53, %v3139_v43 }
 0x1d2   : > { %v895_v51 = vadd.f32 %v2337_v33, %v3141_v44 }
 0x1d4   : > { %v2338_v52 = vpop.f32.mrb[44].mxu0  ;;  %v933_v57 = vpack.c.bf16 %v895_v51, %v894_v46 }
 0x1d5   : > { %v2339_v58 = vpop.f32.mrb[45].mxu0 }
 0x1d6   : > { %v2340_v60 = vadd.f32 %v2339_v58, %v2338_v52  ;;  %v2341_v0 = vpop.f32.mrb[46].mxu0  ;;  %2452 = vmatprep.mubr.bf16.mxu1 %v933_v57 }
 0x1d7   : > { %v2342_v37 = vpop.f32.mrb[47].mxu0 }
 0x1d8   : > { %v2343_v38 = vadd.f32 %v2342_v37, %v2341_v0  ;;  %v896_v2 = vadd.f32 %v2340_v60, %v3151_v49 }
 0x1da   : > { %v897_v6 = vadd.f32 %v2343_v38, %v3153_v50 }
 0x1dc   : > { %v2344_v34 = vpop.f32.mrb[48].mxu0  ;;  %v934_v8 = vpack.c.bf16 %v897_v6, %v896_v2 }
 0x1dd   : > { %v2345_v59 = vpop.f32.mrb[49].mxu0 }
 0x1de   : > { %v2346_v61 = vadd.f32 %v2345_v59, %v2344_v34  ;;  %v2347_v43 = vpop.f32.mrb[50].mxu0  ;;  %2453 = vmatmul.mubr.bf16.gmra.mrb[20].mxu1 %v934_v8 }
 0x1df   : > { %v2348_v44 = vpop.f32.mrb[51].mxu0 }
 0x1e0   : > { %v2349_v36 = vadd.f32 %v2348_v44, %v2347_v43  ;;  %v898_v12 = vadd.f32 %v2346_v61, %v3163_v55 }
 0x1e2   : > { %v899_v14 = vadd.f32 %v2349_v36, %v3165_v56 }
 0x1e4   : > { %v2350_v17 = vpop.f32.mrb[52].mxu0  ;;  %v935_v41 = vpack.c.bf16 %v899_v14, %v898_v12 }
 0x1e5   : > { %v2351_v49 = vpop.f32.mrb[53].mxu0 }
 0x1e6   : > { %v2352_v50 = vadd.f32 %v2351_v49, %v2350_v17  ;;  %v2353_v42 = vpop.f32.mrb[54].mxu0  ;;  %2456 = vmatprep.mubr.bf16.mxu1 %v935_v41 }
 0x1e7   : > { %v2354_v1 = vpop.f32.mrb[55].mxu0 }
 0x1e8   : > { %v2355_v3 = vadd.f32 %v2354_v1, %v2353_v42  ;;  %v900_v19 = vadd.f32 %v2352_v50, %v3175_v62 }
 0x1ea   : > { %v901_v55 = vadd.f32 %v2355_v3, %v3177_v63 }
 0x1ec   : > { %v2356_v20 = vpop.f32.mrb[56].mxu0  ;;  %v936_v56 = vpack.c.bf16 %v901_v55, %v900_v19 }
 0x1ed   : > { %v2357_v21 = vpop.f32.mrb[57].mxu0 }
 0x1ee   : > { %v2358_v22 = vadd.f32 %v2357_v21, %v2356_v20  ;;  %v2359_v23 = vpop.f32.mrb[58].mxu0  ;;  %2457 = vmatmul.mubr.bf16.gmra.mrb[24].mxu1 %v936_v56 }
 0x1ef   : > { %v2360_v24 = vpop.f32.mrb[59].mxu0 }
 0x1f0   : > { %v2361_v25 = vadd.f32 %v2360_v24, %v2359_v23  ;;  %v902_v7 = vadd.f32 %v2358_v22, %v3187_v4 }
 0x1f2   : > { %v903_v9 = vadd.f32 %v2361_v25, %v3189_v5 }
 0x1f4   : > { %v2362_v26 = vpop.f32.mrb[60].mxu0  ;;  %v937_v47 = vpack.c.bf16 %v903_v9, %v902_v7 }
 0x1f5   : > { %v2363_v48 = vpop.f32.mrb[61].mxu0 }
 0x1f6   : > { %v2364_v27 = vadd.f32 %v2363_v48, %v2362_v26  ;;  %v2365_v62 = vpop.f32.mrb[62].mxu0  ;;  %2460 = vmatprep.mubr.bf16.mxu1 %v937_v47 }
 0x1f7   : > { %v2366_v63 = vpop.f32.mrb[63].mxu0 }
 0x1f8   : > { %v2367_v28 = vadd.f32 %v2366_v63, %v2365_v62  ;;  %v904_v29 = vadd.f32 %v2364_v27, %v3199_v10 }
 0x1fa   : > { %v905_v30 = vadd.f32 %v2367_v28, %v3201_v11 }
 0x1fc   : > { %v938_v13 = vpack.c.bf16 %v905_v30, %v904_v29 }
 0x1fe   : > { %2461 = vmatmul.mubr.bf16.gmra.mrb[28].mxu1 %v938_v13 }
 0x261   : > { %v2434_v31 = vpop.f32.mrb[0].mxu1 }
 0x262   : > { %v1036_v4 = vadd.f32 %v2434_v31, %v3262_v15  ;;  %v1027_v5 = vpop.f32.mrb[1].mxu1 }
 0x263   : > { %v1028_v35 = vadd.f32 %v3262_v15, %v1027_v5  ;;  %v2435_v39 = vpop.f32.mrb[2].mxu1 }
 0x264   : > { %v1039_v40 = vadd.f32 %v2435_v39, %v3262_v15  ;;  %v1030_v45 = vpop.f32.mrb[3].mxu1  ;;  %v1156_v54 = vmax.f32 %v1036_v4, 0.0 }
 0x265   : > { %v1031_v53 = vadd.f32 %v3262_v15, %v1030_v45  ;;  %v1154_v32 = vmax.f32 %v1028_v35, 0.0 }
 0x266   : > { %v1157_v10 = vmax.f32 %v1039_v40, 0.0 }
 0x267   : > { %v1155_v11 = vmax.f32 %v1031_v53, 0.0 }
 0x268   : > { %v1206_v33 = vpack.c.bf16 %v1157_v10, %v1156_v54 }
 0x269   : > { %v1205_v46 = vpack.c.bf16 %v1155_v11, %v1154_v32 }
 0x26b   : > { %2480 = vmatprep.mubr.bf16.mxu1 %v1205_v46 }
 0x26c   : > { %2481 = vmatmul.mubr.bf16.vlgmr.msra.gmra.mrb[32].mxu1 %v1206_v33 }
 0x271   : > { %v2438_v51 = vpop.f32.mrb[4].mxu1 }
 0x272   : > { %v1052_v52 = vadd.f32 %v2438_v51, %v3262_v15  ;;  %v1043_v57 = vpop.f32.mrb[5].mxu1 }
 0x273   : > { %v1044_v58 = vadd.f32 %v3262_v15, %v1043_v57  ;;  %v2439_v60 = vpop.f32.mrb[6].mxu1 }
 0x274   : > { %v1055_v0 = vadd.f32 %v2439_v60, %v3262_v15  ;;  %v1046_v37 = vpop.f32.mrb[7].mxu1  ;;  %v1160_v2 = vmax.f32 %v1052_v52, 0.0 }
 0x275   : > { %v1047_v38 = vadd.f32 %v3262_v15, %v1046_v37  ;;  %v1158_v34 = vmax.f32 %v1044_v58, 0.0 }
 0x276   : > { %v1161_v6 = vmax.f32 %v1055_v0, 0.0 }
 0x277   : > { %v1159_v8 = vmax.f32 %v1047_v38, 0.0 }
 0x278   : > { %v1208_v59 = vpack.c.bf16 %v1161_v6, %v1160_v2 }
 0x279   : > { %v1207_v61 = vpack.c.bf16 %v1159_v8, %v1158_v34 }
 0x27b   : > { %2484 = vmatprep.mubr.bf16.mxu1 %v1207_v61 }
 0x27c   : > { %2485 = vmatmul.mubr.bf16.gmra.mrb[36].mxu1 %v1208_v59 }
 0x281   : > { %v2442_v43 = vpop.f32.mrb[8].mxu1 }
 0x282   : > { %v1068_v44 = vadd.f32 %v2442_v43, %v3262_v15  ;;  %v1059_v36 = vpop.f32.mrb[9].mxu1 }
 0x283   : > { %v1060_v12 = vadd.f32 %v3262_v15, %v1059_v36  ;;  %v2443_v14 = vpop.f32.mrb[10].mxu1 }
 0x284   : > { %v1071_v16 = vadd.f32 %v2443_v14, %v3262_v15  ;;  %v1062_v17 = vpop.f32.mrb[11].mxu1  ;;  %v1164_v49 = vmax.f32 %v1068_v44, 0.0 }
 0x285   : > { %v1063_v41 = vadd.f32 %v3262_v15, %v1062_v17  ;;  %v1162_v42 = vmax.f32 %v1060_v12, 0.0 }
 0x286   : > { %v1165_v50 = vmax.f32 %v1071_v16, 0.0 }
 0x287   : > { %v1163_v18 = vmax.f32 %v1063_v41, 0.0 }
 0x288   : > { %v1210_v1 = vpack.c.bf16 %v1165_v50, %v1164_v49 }
 0x289   : > { %v1209_v3 = vpack.c.bf16 %v1163_v18, %v1162_v42 }
 0x28b   : > { %2488 = vmatprep.mubr.bf16.mxu1 %v1209_v3 }
 0x28c   : > { %2489 = vmatmul.mubr.bf16.gmra.mrb[40].mxu1 %v1210_v1 }
 0x291   : > { %v2446_v19 = vpop.f32.mrb[12].mxu1 }
 0x292   : > { %v1084_v55 = vadd.f32 %v2446_v19, %v3262_v15  ;;  %v1075_v20 = vpop.f32.mrb[13].mxu1 }
 0x293   : > { %v1076_v56 = vadd.f32 %v3262_v15, %v1075_v20  ;;  %v2447_v21 = vpop.f32.mrb[14].mxu1 }
 0x294   : > { %v1087_v22 = vadd.f32 %v2447_v21, %v3262_v15  ;;  %v1078_v23 = vpop.f32.mrb[15].mxu1  ;;  %v1168_v25 = vmax.f32 %v1084_v55, 0.0 }
 0x295   : > { %v1079_v24 = vadd.f32 %v3262_v15, %v1078_v23  ;;  %v1166_v9 = vmax.f32 %v1076_v56, 0.0 }
 0x296   : > { %v1169_v7 = vmax.f32 %v1087_v22, 0.0 }
 0x297   : > { %v1167_v26 = vmax.f32 %v1079_v24, 0.0 }
 0x298   : > { %v1212_v47 = vpack.c.bf16 %v1169_v7, %v1168_v25 }
 0x299   : > { %v1211_v48 = vpack.c.bf16 %v1167_v26, %v1166_v9 }
 0x29b   : > { %2492 = vmatprep.mubr.bf16.mxu1 %v1211_v48 }
 0x29c   : > { %2493 = vmatmul.mubr.bf16.gmra.mrb[44].mxu1 %v1212_v47  ;;  %v3297_v47 = vld [vmem:[%s3105_s30 + $0x1] ss:$0 sm:$0xff] }
 0x2a1   : > { %v2450_v27 = vpop.f32.mrb[16].mxu1 }
 0x2a2   : > { %v1100_v62 = vadd.f32 %v2450_v27, %v3262_v15  ;;  %v1091_v63 = vpop.f32.mrb[17].mxu1 }
 0x2a3   : > { %v1092_v28 = vadd.f32 %v3262_v15, %v1091_v63  ;;  %v2451_v29 = vpop.f32.mrb[18].mxu1 }
 0x2a4   : > { %v1103_v30 = vadd.f32 %v2451_v29, %v3262_v15  ;;  %v1094_v13 = vpop.f32.mrb[19].mxu1  ;;  %v1172_v4 = vmax.f32 %v1100_v62, 0.0 }
 0x2a5   : > { %v1095_v31 = vadd.f32 %v3262_v15, %v1094_v13  ;;  %v1170_v35 = vmax.f32 %v1092_v28, 0.0 }
 0x2a6   : > { %v1173_v5 = vmax.f32 %v1103_v30, 0.0 }
 0x2a7   : > { %v1171_v39 = vmax.f32 %v1095_v31, 0.0 }
 0x2a8   : > { %v1214_v40 = vpack.c.bf16 %v1173_v5, %v1172_v4 }
 0x2a9   : > { %v1213_v45 = vpack.c.bf16 %v1171_v39, %v1170_v35 }
 0x2ab   : > { %2496 = vmatprep.mubr.bf16.mxu1 %v1213_v45 }
 0x2ac   : > { %2497 = vmatmul.mubr.bf16.gmra.mrb[48].mxu1 %v1214_v40 }
 0x2b1   : > { %v2454_v53 = vpop.f32.mrb[20].mxu1 }
 0x2b2   : > { %v1116_v54 = vadd.f32 %v2454_v53, %v3262_v15  ;;  %v1107_v10 = vpop.f32.mrb[21].mxu1 }
 0x2b3   : > { %v1108_v32 = vadd.f32 %v3262_v15, %v1107_v10  ;;  %v2455_v11 = vpop.f32.mrb[22].mxu1 }
 0x2b4   : > { %v1119_v33 = vadd.f32 %v2455_v11, %v3262_v15  ;;  %v1110_v46 = vpop.f32.mrb[23].mxu1  ;;  %v1176_v52 = vmax.f32 %v1116_v54, 0.0 }
 0x2b5   : > { %v1111_v51 = vadd.f32 %v3262_v15, %v1110_v46  ;;  %v1174_v58 = vmax.f32 %v1108_v32, 0.0 }
 0x2b6   : > { %v1177_v57 = vmax.f32 %v1119_v33, 0.0 }
 0x2b7   : > { %v1175_v60 = vmax.f32 %v1111_v51, 0.0 }
 0x2b8   : > { %v1216_v0 = vpack.c.bf16 %v1177_v57, %v1176_v52 }
 0x2b9   : > { %v1215_v37 = vpack.c.bf16 %v1175_v60, %v1174_v58 }
 0x2bb   : > { %2500 = vmatprep.mubr.bf16.mxu1 %v1215_v37 }
 0x2bc   : > { %2501 = vmatmul.mubr.bf16.gmra.mrb[52].mxu1 %v1216_v0 }
 0x2c1   : > { %v2458_v38 = vpop.f32.mrb[24].mxu1 }
 0x2c2   : > { %v1132_v2 = vadd.f32 %v2458_v38, %v3262_v15  ;;  %v1123_v6 = vpop.f32.mrb[25].mxu1 }
 0x2c3   : > { %v1124_v34 = vadd.f32 %v3262_v15, %v1123_v6  ;;  %v2459_v8 = vpop.f32.mrb[26].mxu1 }
 0x2c4   : > { %v1135_v59 = vadd.f32 %v2459_v8, %v3262_v15  ;;  %v1126_v61 = vpop.f32.mrb[27].mxu1  ;;  %v1180_v44 = vmax.f32 %v1132_v2, 0.0 }
 0x2c5   : > { %v1127_v43 = vadd.f32 %v3262_v15, %v1126_v61  ;;  %v1178_v12 = vmax.f32 %v1124_v34, 0.0 }
 0x2c6   : > { %v1181_v36 = vmax.f32 %v1135_v59, 0.0 }
 0x2c7   : > { %v1179_v14 = vmax.f32 %v1127_v43, 0.0 }
 0x2c8   : > { %v1218_v16 = vpack.c.bf16 %v1181_v36, %v1180_v44 }
 0x2c9   : > { %v1217_v17 = vpack.c.bf16 %v1179_v14, %v1178_v12 }
 0x2cb   : > { %2504 = vmatprep.mubr.bf16.mxu1 %v1217_v17 }
 0x2cc   : > { %2505 = vmatmul.mubr.bf16.gmra.mrb[56].mxu1 %v1218_v16 }
 0x2d1   : > { %v2462_v41 = vpop.f32.mrb[28].mxu1 }
 0x2d2   : > { %v1148_v49 = vadd.f32 %v2462_v41, %v3262_v15  ;;  %v1139_v50 = vpop.f32.mrb[29].mxu1 }
 0x2d3   : > { %v1140_v42 = vadd.f32 %v3262_v15, %v1139_v50  ;;  %v2463_v18 = vpop.f32.mrb[30].mxu1 }
 0x2d4   : > { %v1151_v1 = vadd.f32 %v2463_v18, %v3262_v15  ;;  %v1142_v3 = vpop.f32.mrb[31].mxu1  ;;  %v1184_v55 = vmax.f32 %v1148_v49, 0.0 }
 0x2d5   : > { %v1143_v19 = vadd.f32 %v3262_v15, %v1142_v3  ;;  %v1182_v56 = vmax.f32 %v1140_v42, 0.0 }
 0x2d6   : > { %v1185_v20 = vmax.f32 %v1151_v1, 0.0 }
 0x2d7   : > { %v1183_v21 = vmax.f32 %v1143_v19, 0.0 }
 0x2d8   : > { %v1220_v22 = vpack.c.bf16 %v1185_v20, %v1184_v55 }
 0x2d9   : > { %v1219_v23 = vpack.c.bf16 %v1183_v21, %v1182_v56 }
 0x2db   : > { %2508 = vmatprep.mubr.bf16.mxu1 %v1219_v23 }
 0x2dc   : > { %2509 = vmatmul.mubr.bf16.gmra.mrb[60].mxu1 %v1220_v22 }
 0x33f   : > { %v2482_v24 = vpop.f32.mrb[32].mxu1 }
 0x340   : > { %v1309_v25 = vpop.f32.mrb[33].mxu1  ;;  %v1318_v63 = vadd.f32 %v2482_v24, %v3297_v47 }
 0x341   : > { %v2483_v7 = vpop.f32.mrb[34].mxu1  ;;  %v1310_v28 = vadd.f32 %v3297_v47, %v1309_v25 }
 0x342   : > { %v1312_v9 = vpop.f32.mrb[35].mxu1  ;;  %v3304_v30 = vmax.f32 %v1318_v63, 0.0  ;;  %v1321_v31 = vadd.f32 %v2483_v7, %v3297_v47 }
 0x343   : > { %v1313_v27 = vadd.f32 %v3297_v47, %v1312_v9  ;;  %v3306_v13 = vmax.f32 %v1310_v28, 0.0 }
 0x344   : > { %v1667_v35 = vmul.f32 0.0, %v3304_v30  ;;  %v3313_v39 = vmax.f32 %v1321_v31, 0.0 }
 0x345   : > { %v3302_v29 = vmax.f32 %v1313_v27, 0.0 }
 0x346   : > { %v1668_v54 = vmul.f32 0.0, %v3313_v39 }
 0x347   : > { %v1697_v5 = vadd.f32 %v3302_v29, %v3306_v13 }
 0x349   : > { %v1698_v53 = vadd.f32 %v1697_v5, %v1667_v35 }
 0x34b   : > { %v1699_v51 = vadd.f32 %v1698_v53, %v1668_v54 }
 0x34f   : > { %v2486_v26 = vpop.f32.mrb[36].mxu1 }
 0x350   : > { %v1325_v48 = vpop.f32.mrb[37].mxu1  ;;  %v1334_v46 = vadd.f32 %v2486_v26, %v3297_v47 }
 0x351   : > { %v2487_v62 = vpop.f32.mrb[38].mxu1  ;;  %v1326_v4 = vadd.f32 %v3297_v47, %v1325_v48 }
 0x352   : > { %v1328_v15 = vpop.f32.mrb[39].mxu1  ;;  %v3324_v0 = vmax.f32 %v1334_v46, 0.0  ;;  %v1337_v37 = vadd.f32 %v2487_v62, %v3297_v47 }
 0x353   : > { %v3315_v40 = vmax.f32 %v1326_v4, 0.0  ;;  %v1329_v45 = vadd.f32 %v3297_v47, %v1328_v15 }
 0x354   : > { %v1671_v6 = vmul.f32 0.0, %v3324_v0  ;;  %v3329_v34 = vmax.f32 %v1337_v37, 0.0 }
 0x355   : > { %v1669_v10 = vmul.f32 0.0, %v3315_v40  ;;  %v3320_v32 = vmax.f32 %v1329_v45, 0.0 }
 0x356   : > { %v1672_v43 = vmul.f32 0.0, %v3329_v34 }
 0x357   : > { %v1700_v58 = vadd.f32 %v1699_v51, %v1669_v10  ;;  %v1670_v60 = vmul.f32 0.0, %v3320_v32 }
 0x359   : > { %v1701_v2 = vadd.f32 %v1700_v58, %v1670_v60 }
 0x35b   : > { %v1702_v61 = vadd.f32 %v1701_v2, %v1671_v6 }
 0x35d   : > { %v1703_v14 = vadd.f32 %v1702_v61, %v1672_v43 }
 0x35f   : > { %v2490_v11 = vpop.f32.mrb[40].mxu1 }
 0x360   : > { %v1341_v33 = vpop.f32.mrb[41].mxu1  ;;  %v1350_v12 = vadd.f32 %v2490_v11, %v3297_v47 }
 0x361   : > { %v2491_v52 = vpop.f32.mrb[42].mxu1  ;;  %v1342_v38 = vadd.f32 %v3297_v47, %v1341_v33 }
 0x362   : > { %v1344_v57 = vpop.f32.mrb[43].mxu1  ;;  %v3340_v18 = vmax.f32 %v1350_v12, 0.0  ;;  %v1353_v1 = vadd.f32 %v2491_v52, %v3297_v47 }
 0x363   : > { %v3331_v8 = vmax.f32 %v1342_v38, 0.0  ;;  %v1345_v59 = vadd.f32 %v3297_v47, %v1344_v57 }
 0x364   : > { %v1675_v55 = vmul.f32 0.0, %v3340_v18  ;;  %v3345_v20 = vmax.f32 %v1353_v1, 0.0 }
 0x365   : > { %v1673_v44 = vmul.f32 0.0, %v3331_v8  ;;  %v3336_v36 = vmax.f32 %v1345_v59, 0.0 }
 0x366   : > { %v1676_v23 = vmul.f32 0.0, %v3345_v20 }
 0x367   : > { %v1704_v41 = vadd.f32 %v1703_v14, %v1673_v44  ;;  %v1674_v49 = vmul.f32 0.0, %v3336_v36 }
 0x369   : > { %v1705_v19 = vadd.f32 %v1704_v41, %v1674_v49 }
 0x36b   : > { %v1706_v22 = vadd.f32 %v1705_v19, %v1675_v55 }
 0x36d   : > { %v1707_v9 = vadd.f32 %v1706_v22, %v1676_v23 }
 0x36f   : > { %v2494_v16 = vpop.f32.mrb[44].mxu1 }
 0x370   : > { %v1357_v17 = vpop.f32.mrb[45].mxu1  ;;  %v1366_v7 = vadd.f32 %v2494_v16, %v3297_v47 }
 0x371   : > { %v2495_v50 = vpop.f32.mrb[46].mxu1  ;;  %v1358_v3 = vadd.f32 %v3297_v47, %v1357_v17 }
 0x372   : > { %v1360_v42 = vpop.f32.mrb[47].mxu1  ;;  %v3356_v15 = vmax.f32 %v1366_v7, 0.0  ;;  %v1369_v63 = vadd.f32 %v2495_v50, %v3297_v47 }
 0x373   : > { %v3347_v56 = vmax.f32 %v1358_v3, 0.0  ;;  %v1361_v21 = vadd.f32 %v3297_v47, %v1360_v42 }
 0x374   : > { %v1679_v35 = vmul.f32 0.0, %v3356_v15  ;;  %v3361_v45 = vmax.f32 %v1369_v63, 0.0 }
 0x375   : > { %v1677_v24 = vmul.f32 0.0, %v3347_v56  ;;  %v3352_v25 = vmax.f32 %v1361_v21, 0.0 }
 0x376   : > { %v1680_v11 = vmul.f32 0.0, %v3361_v45 }
 0x377   : > { %v1708_v26 = vadd.f32 %v1707_v9, %v1677_v24  ;;  %v1678_v48 = vmul.f32 0.0, %v3352_v25 }
 0x379   : > { %v1709_v5 = vadd.f32 %v1708_v26, %v1678_v48 }
 0x37b   : > { %v1710_v10 = vadd.f32 %v1709_v5, %v1679_v35 }
 0x37d   : > { %v1711_v52 = vadd.f32 %v1710_v10, %v1680_v11 }
 0x37f   : > { %v2498_v27 = vpop.f32.mrb[48].mxu1 }
 0x380   : > { %v1373_v62 = vpop.f32.mrb[49].mxu1  ;;  %v1382_v51 = vadd.f32 %v2498_v27, %v3297_v47 }
 0x381   : > { %v1374_v28 = vadd.f32 %v3297_v47, %v1373_v62  ;;  %v2499_v31 = vpop.f32.mrb[50].mxu1 }
 0x382   : > { %v1376_v4 = vpop.f32.mrb[51].mxu1  ;;  %v3372_v60 = vmax.f32 %v1382_v51, 0.0  ;;  %v1385_v37 = vadd.f32 %v2499_v31, %v3297_v47 }
 0x383   : > { %v3363_v53 = vmax.f32 %v1374_v28, 0.0  ;;  %v1377_v54 = vadd.f32 %v3297_v47, %v1376_v4 }
 0x384   : > { %v1683_v44 = vmul.f32 0.0, %v3372_v60  ;;  %v3377_v12 = vmax.f32 %v1385_v37, 0.0 }
 0x385   : > { %v1681_v33 = vmul.f32 0.0, %v3363_v53  ;;  %v3368_v46 = vmax.f32 %v1377_v54, 0.0 }
 0x386   : > { %v1684_v41 = vmul.f32 0.0, %v3377_v12 }
 0x387   : > { %v1712_v57 = vadd.f32 %v1711_v52, %v1681_v33  ;;  %v1682_v58 = vmul.f32 0.0, %v3368_v46 }
 0x389   : > { %v1713_v6 = vadd.f32 %v1712_v57, %v1682_v58 }
 0x38b   : > { %v1714_v17 = vadd.f32 %v1713_v6, %v1683_v44 }
 0x38d   : > { %v1715_v1 = vadd.f32 %v1714_v17, %v1684_v41 }
 0x38f   : > { %v2502_v38 = vpop.f32.mrb[52].mxu1 }
 0x390   : > { %v1389_v2 = vpop.f32.mrb[53].mxu1  ;;  %v1398_v42 = vadd.f32 %v2502_v38, %v3297_v47 }
 0x391   : > { %v1390_v59 = vadd.f32 %v3297_v47, %v1389_v2  ;;  %v2503_v61 = vpop.f32.mrb[54].mxu1 }
 0x392   : > { %v1392_v43 = vpop.f32.mrb[55].mxu1  ;;  %v3388_v55 = vmax.f32 %v1398_v42, 0.0  ;;  %v1401_v21 = vadd.f32 %v2503_v61, %v3297_v47 }
 0x393   : > { %v3379_v14 = vmax.f32 %v1390_v59, 0.0  ;;  %v1393_v16 = vadd.f32 %v3297_v47, %v1392_v43 }
 0x394   : > { %v1687_v7 = vmul.f32 0.0, %v3388_v55  ;;  %v3392_v9 = vmax.f32 %v1401_v21, 0.0 }
 0x395   : > { %v1685_v49 = vmul.f32 0.0, %v3379_v14  ;;  %v3384_v50 = vmax.f32 %v1393_v16, 0.0 }
 0x396   : > { %v1688_v31 = vmul.f32 0.0, %v3392_v9 }
 0x397   : > { %v1716_v3 = vadd.f32 %v1715_v1, %v1685_v49  ;;  %v1686_v19 = vmul.f32 0.0, %v3384_v50 }
 0x399   : > { %v1717_v22 = vadd.f32 %v1716_v3, %v1686_v19 }
 0x39b   : > { %v1718_v62 = vadd.f32 %v1717_v22, %v1687_v7 }
 0x39d   : > { %v1719_v54 = vadd.f32 %v1718_v62, %v1688_v31 }
 0x39f   : > { %v2506_v23 = vpop.f32.mrb[56].mxu1 }
 0x3a0   : > { %v1405_v24 = vpop.f32.mrb[57].mxu1  ;;  %v1414_v35 = vadd.f32 %v2506_v23, %v3297_v47 }
 0x3a1   : > { %v1406_v26 = vadd.f32 %v3297_v47, %v1405_v24  ;;  %v2507_v48 = vpop.f32.mrb[58].mxu1 }
 0x3a2   : > { %v1408_v27 = vpop.f32.mrb[59].mxu1  ;;  %v3404_v33 = vmax.f32 %v1414_v35, 0.0  ;;  %v1417_v51 = vadd.f32 %v2507_v48, %v3297_v47 }
 0x3a3   : > { %v3395_v63 = vmax.f32 %v1406_v26, 0.0  ;;  %v1409_v28 = vadd.f32 %v3297_v47, %v1408_v27 }
 0x3a4   : > { %v1691_v57 = vmul.f32 0.0, %v3404_v33  ;;  %v3408_v58 = vmax.f32 %v1417_v51, 0.0 }
 0x3a5   : > { %v1689_v4 = vmul.f32 0.0, %v3395_v63  ;;  %v3400_v5 = vmax.f32 %v1409_v28, 0.0 }
 0x3a6   : > { %v1692_v44 = vmul.f32 0.0, %v3408_v58 }
 0x3a7   : > { %v1720_v10 = vadd.f32 %v1719_v54, %v1689_v4  ;;  %v1690_v11 = vmul.f32 0.0, %v3400_v5 }
 0x3a9   : > { %v1721_v52 = vadd.f32 %v1720_v10, %v1690_v11 }
 0x3ab   : > { %v1722_v2 = vadd.f32 %v1721_v52, %v1691_v57 }
 0x3ad   : > { %v1723_v1 = vadd.f32 %v1722_v2, %v1692_v44 }
 0x3af   : > { %v2510_v37 = vpop.f32.mrb[60].mxu1 }
 0x3b0   : > { %v1421_v38 = vpop.f32.mrb[61].mxu1  ;;  %v1430_v6 = vadd.f32 %v2510_v37, %v3297_v47 }
 0x3b1   : > { %v1422_v59 = vadd.f32 %v3297_v47, %v1421_v38  ;;  %v2511_v61 = vpop.f32.mrb[62].mxu1 }
 0x3b2   : > { %v1424_v43 = vpop.f32.mrb[63].mxu1  ;;  %v1433_v17 = vadd.f32 %v2511_v61, %v3297_v47  ;;  %v3417_v49 = vmax.f32 %v1430_v6, 0.0 }
 0x3b3   : > { %v3413_v16 = vmax.f32 %v1422_v59, 0.0  ;;  %v1425_v41 = vadd.f32 %v3297_v47, %v1424_v43 }
 0x3b4   : > { %v3422_v21 = vmax.f32 %v1433_v17, 0.0  ;;  %v1695_v23 = vmul.f32 0.0, %v3417_v49 }
 0x3b5   : > { %v1693_v42 = vmul.f32 0.0, %v3413_v16  ;;  %v3420_v3 = vmax.f32 %v1425_v41, 0.0 }
 0x3b6   : > { %v1696_v7 = vmul.f32 0.0, %v3422_v21 }
 0x3b7   : > { %v1724_v19 = vadd.f32 %v1723_v1, %v1693_v42  ;;  %v1694_v22 = vmul.f32 0.0, %v3420_v3 }
 0x3b9   : > { %v1725_v24 = vadd.f32 %v1724_v19, %v1694_v22 }
 0x3bb   : > { %v1726_v26 = vadd.f32 %v1725_v24, %v1695_v23 }
 0x3bd   : > { %v1727_v48 = vadd.f32 %v1726_v26, %v1696_v7 }
 0x3bf   : > { %v1728_v47 = vrot.slane %v1727_v48, 4 }
 0x3c1   : > { %v1729_v27 = vadd.f32 %v1728_v47, %v1727_v48 }
 0x3c3   : > { %v1730_v62 = vrot.slane %v1729_v27, 2 }
 0x3c5   : > { %v1731_v28 = vadd.f32 %v1730_v62, %v1729_v27 }
 0x3c7   : > { %v1732_v31 = vrot.slane %v1731_v28, 1 }
 0x3c9   : > { %v1733_v4 = vadd.f32 %v1732_v31, %v1731_v28 }
 0x3cb   : > { %v3427_v35 = vmul.f32 0.0625, %v1733_v4 }
 0x3cd   : > { %v1737_v54 = vsub.f32 %v3304_v30, %v3427_v35  ;;  %v1735_v10 = vsub.f32 %v3306_v13, %v3427_v35  ;;  %v1736_v11 = vsub.f32 %v3302_v29, %v3427_v35  ;;  %v1738_v51 = vsub.f32 %v3313_v39, %v3427_v35 }
 0x3ce   : > { %v1739_v57 = vsub.f32 %v3315_v40, %v3427_v35  ;;  %v1740_v2 = vsub.f32 %v3320_v32, %v3427_v35  ;;  %v1741_v61 = vsub.f32 %v3324_v0, %v3427_v35  ;;  %v1742_v17 = vsub.f32 %v3329_v34, %v3427_v35 }
 0x3cf   : > { %v1769_v52 = vmul.f32 0.0, %v1737_v54  ;;  %v1799_v37 = vmul.f32 %v1735_v10, %v1735_v10  ;;  %v1800_v38 = vmul.f32 %v1736_v11, %v1736_v11  ;;  %v1770_v6 = vmul.f32 0.0, %v1738_v51 }
 0x3d0   : > { %v1771_v43 = vmul.f32 0.0, %v1739_v57  ;;  %v1772_v41 = vmul.f32 0.0, %v1740_v2  ;;  %v1743_v19 = vsub.f32 %v3331_v8, %v3427_v35  ;;  %v1773_v22 = vmul.f32 0.0, %v1741_v61 }
 0x3d1   : > { %v1801_v59 = vmul.f32 %v1769_v52, %v1769_v52  ;;  %v1831_v44 = vadd.f32 %v1800_v38, %v1799_v37  ;;  %v1802_v42 = vmul.f32 %v1770_v6, %v1770_v6  ;;  %v1744_v7 = vsub.f32 %v3336_v36, %v3427_v35 }
 0x3d2   : > { %v1803_v23 = vmul.f32 %v1771_v43, %v1771_v43  ;;  %v1774_v26 = vmul.f32 0.0, %v1742_v17  ;;  %v1804_v48 = vmul.f32 %v1772_v41, %v1772_v41  ;;  %v1745_v27 = vsub.f32 %v3340_v18, %v3427_v35 }
 0x3d3   : > { %v1832_v1 = vadd.f32 %v1831_v44, %v1801_v59  ;;  %v1775_v62 = vmul.f32 0.0, %v1743_v19  ;;  %v1805_v28 = vmul.f32 %v1773_v22, %v1773_v22  ;;  %v1746_v4 = vsub.f32 %v3345_v20, %v3427_v35 }
 0x3d4   : > { %v1776_v54 = vmul.f32 0.0, %v1744_v7  ;;  %v1806_v10 = vmul.f32 %v1774_v26, %v1774_v26  ;;  %v1747_v51 = vsub.f32 %v3347_v56, %v3427_v35  ;;  %v1777_v52 = vmul.f32 0.0, %v1745_v27 }
 0x3d5   : > { %v1833_v24 = vadd.f32 %v1832_v1, %v1802_v42  ;;  %v1807_v57 = vmul.f32 %v1775_v62, %v1775_v62  ;;  %v1748_v38 = vsub.f32 %v3352_v25, %v3427_v35  ;;  %v1778_v2 = vmul.f32 0.0, %v1746_v4 }
 0x3d6   : > { %v1808_v6 = vmul.f32 %v1776_v54, %v1776_v54  ;;  %v1749_v61 = vsub.f32 %v3356_v15, %v3427_v35  ;;  %v1779_v43 = vmul.f32 0.0, %v1747_v51  ;;  %v1809_v44 = vmul.f32 %v1777_v52, %v1777_v52 }
 0x3d7   : > { %v1834_v47 = vadd.f32 %v1833_v24, %v1803_v23  ;;  %v1750_v41 = vsub.f32 %v3361_v45, %v3427_v35  ;;  %v1780_v42 = vmul.f32 0.0, %v1748_v38  ;;  %v1810_v1 = vmul.f32 %v1778_v2, %v1778_v2 }
 0x3d8   : > { %v1751_v22 = vsub.f32 %v3363_v53, %v3427_v35  ;;  %v1781_v23 = vmul.f32 0.0, %v1749_v61  ;;  %v1811_v24 = vmul.f32 %v1779_v43, %v1779_v43  ;;  %v1752_v26 = vsub.f32 %v3368_v46, %v3427_v35 }
 0x3d9   : > { %v1835_v31 = vadd.f32 %v1834_v47, %v1804_v48  ;;  %v1782_v48 = vmul.f32 0.0, %v1750_v41  ;;  %v1812_v47 = vmul.f32 %v1780_v42, %v1780_v42  ;;  %v1753_v62 = vsub.f32 %v3372_v60, %v3427_v35 }
 0x3da   : > { %v1754_v54 = vsub.f32 %v3377_v12, %v3427_v35  ;;  %v1755_v52 = vsub.f32 %v3379_v14, %v3427_v35  ;;  %v1756_v2 = vsub.f32 %v3384_v50, %v3427_v35  ;;  %v1757_v43 = vsub.f32 %v3388_v55, %v3427_v35 }
 0x3db   : > { %v1836_v11 = vadd.f32 %v1835_v31, %v1805_v28  ;;  %v1783_v28 = vmul.f32 0.0, %v1751_v22  ;;  %v1813_v31 = vmul.f32 %v1781_v23, %v1781_v23  ;;  %v1758_v42 = vsub.f32 %v3392_v9, %v3427_v35 }
 0x3dc   : > { %v1759_v23 = vsub.f32 %v3395_v63, %v3427_v35 }
 0x3dd   : > { %v1837_v37 = vadd.f32 %v1836_v11, %v1806_v10  ;;  %v1784_v10 = vmul.f32 0.0, %v1752_v26  ;;  %v1814_v11 = vmul.f32 %v1782_v48, %v1782_v48  ;;  %v1760_v48 = vsub.f32 %v3400_v5, %v3427_v35 }
 0x3df   : > { %v1838_v59 = vadd.f32 %v1837_v37, %v1807_v57  ;;  %v1785_v57 = vmul.f32 0.0, %v1753_v62  ;;  %v1815_v37 = vmul.f32 %v1783_v28, %v1783_v28  ;;  %v1761_v28 = vsub.f32 %v3404_v33, %v3427_v35 }
 0x3e1   : > { %v1839_v17 = vadd.f32 %v1838_v59, %v1808_v6  ;;  %v1786_v6 = vmul.f32 0.0, %v1754_v54  ;;  %v1816_v59 = vmul.f32 %v1784_v10, %v1784_v10  ;;  %v1762_v10 = vsub.f32 %v3408_v58, %v3427_v35 }
 0x3e3   : > { %v1840_v19 = vadd.f32 %v1839_v17, %v1809_v44  ;;  %v1787_v44 = vmul.f32 0.0, %v1755_v52  ;;  %v1817_v17 = vmul.f32 %v1785_v57, %v1785_v57  ;;  %v1763_v57 = vsub.f32 %v3413_v16, %v3427_v35 }
 0x3e5   : > { %v1841_v7 = vadd.f32 %v1840_v19, %v1810_v1  ;;  %v1788_v1 = vmul.f32 0.0, %v1756_v2  ;;  %v1818_v19 = vmul.f32 %v1786_v6, %v1786_v6  ;;  %v1764_v6 = vsub.f32 %v3420_v3, %v3427_v35 }
 0x3e7   : > { %v1842_v27 = vadd.f32 %v1841_v7, %v1811_v24  ;;  %v1789_v24 = vmul.f32 0.0, %v1757_v43  ;;  %v1819_v7 = vmul.f32 %v1787_v44, %v1787_v44  ;;  %v1765_v44 = vsub.f32 %v3417_v49, %v3427_v35 }
 0x3e9   : > { %v1843_v4 = vadd.f32 %v1842_v27, %v1812_v47  ;;  %v1790_v47 = vmul.f32 0.0, %v1758_v42  ;;  %v1820_v27 = vmul.f32 %v1788_v1, %v1788_v1  ;;  %v1766_v1 = vsub.f32 %v3422_v21, %v3427_v35 }
 0x3eb   : > { %v1844_v51 = vadd.f32 %v1843_v4, %v1813_v31  ;;  %v1791_v31 = vmul.f32 0.0, %v1759_v23  ;;  %v1821_v4 = vmul.f32 %v1789_v24, %v1789_v24  ;;  %v1797_v24 = vmul.f32 0.0, %v1765_v44 }
 0x3ed   : > { %v1845_v38 = vadd.f32 %v1844_v51, %v1814_v11  ;;  %v1792_v11 = vmul.f32 0.0, %v1760_v48  ;;  %v1822_v51 = vmul.f32 %v1790_v47, %v1790_v47  ;;  %v1798_v48 = vmul.f32 0.0, %v1766_v1 }
 0x3ef   : > { %v1846_v61 = vadd.f32 %v1845_v38, %v1815_v37  ;;  %v1793_v37 = vmul.f32 0.0, %v1761_v28  ;;  %v1823_v38 = vmul.f32 %v1791_v31, %v1791_v31  ;;  %v1830_v31 = vmul.f32 %v1798_v48, %v1798_v48 }
 0x3f1   : > { %v1847_v41 = vadd.f32 %v1846_v61, %v1816_v59  ;;  %v1794_v59 = vmul.f32 0.0, %v1762_v10  ;;  %v1824_v61 = vmul.f32 %v1792_v11, %v1792_v11 }
 0x3f3   : > { %v1848_v22 = vadd.f32 %v1847_v41, %v1817_v17  ;;  %v1795_v17 = vmul.f32 0.0, %v1763_v57  ;;  %v1825_v41 = vmul.f32 %v1793_v37, %v1793_v37 }
 0x3f5   : > { %v1849_v26 = vadd.f32 %v1848_v22, %v1818_v19  ;;  %v1796_v19 = vmul.f32 0.0, %v1764_v6  ;;  %v1826_v22 = vmul.f32 %v1794_v59, %v1794_v59  ;;  %v1877_v6 = vlaneseq }
 0x3f7   : > { %v1850_v62 = vadd.f32 %v1849_v26, %v1819_v7  ;;  %v1827_v7 = vmul.f32 %v1795_v17, %v1795_v17  ;;  %v1828_v47 = vmul.f32 %v1796_v19, %v1796_v19  ;;  %v1878_v59 = vshrl.u32 %v1877_v6, 7 }
 0x3f9   : > { %v1851_v54 = vadd.f32 %v1850_v62, %v1820_v27  ;;  %v1829_v62 = vmul.f32 %v1797_v24, %v1797_v24 }
 0x3fb   : > { %v1852_v52 = vadd.f32 %v1851_v54, %v1821_v4 }
 0x3fd   : > { %v1853_v2 = vadd.f32 %v1852_v52, %v1822_v51 }
 0x3ff   : > { %v1854_v43 = vadd.f32 %v1853_v2, %v1823_v38 }
 0x401   : > { %v1855_v42 = vadd.f32 %v1854_v43, %v1824_v61  ;;  %v1869_v61 = vld [vmem:[%s364_s12] sm:$0x1]  ;;  %v1879_v43 = vsub.s32 0, %v1878_v59  ;;  %s2852_s12 = smov [#allocation10]  }
 0x402   : > { %s2757_s20 = sshll.u32 %s2852_s12, 4  ;;  %s2758_s20 = int_to_ptr.vmem [resolvable:$false] %s2757_s20 }
 0x403   : > { %v1856_v23 = vadd.f32 %v1855_v42, %v1825_v41  ;;  %v1870_v41 = vld [vmem:[%s367_s13] sm:$0x1]  ;;  %s2759_s29 = scalar_lea.vmem %s2758_s20, 8192  ;;  %p2760_p1 = scmp.lt.s32.totalorder %s3617_s15, %s2758_s20 }
 0x404   : > { %p2761_p7 = scmp.lt.s32.totalorder %s2759_s29, %s2753_s14 }
 0x405   : > { %v1857_v26 = vadd.f32 %v1856_v23, %v1826_v22 }
 0x406   : > { %p2762_p10 = por %p2761_p7, %p2760_p1 }
 0x407   : > { %v1858_v27 = vadd.f32 %v1857_v26, %v1827_v7 }
 0x408   : > { %p2763_p11 = pnand %p2762_p10, %p2756_p13 }
 0x409   : > { %v1859_v28 = vadd.f32 %v1858_v27, %v1828_v47 }
 0x40b   : > { %v1860_v4 = vadd.f32 %v1859_v28, %v1829_v62 }
 0x40d   : > { %v1861_v54 = vadd.f32 %v1860_v4, %v1830_v31 }
 0x40f   : > { %v1862_v10 = vrot.slane %v1861_v54, 4 }
 0x411   : > { %v1863_v11 = vadd.f32 %v1862_v10, %v1861_v54 }
 0x413   : > { %v1864_v51 = vrot.slane %v1863_v11, 2 }
 0x415   : > { %v1865_v52 = vadd.f32 %v1864_v51, %v1863_v11 }
 0x417   : > { %v1866_v57 = vrot.slane %v1865_v52, 1 }
 0x419   : > { %v1867_v37 = vadd.f32 %v1866_v57, %v1865_v52 }
 0x41b   : > { %v1868_v38 = vmul.f32 0.0625, %v1867_v37 }
 0x41d   : > { %v1871_v2 = vadd.f32 1e-05, %v1868_v38 }
 0x41f   : > { %2665 = vrsqrt.f32 %v1871_v2 }
 0x429   : > { %v2666_v44 = vpop.eup %2665 }
 0x42a   : > { %v1873_v17 = vmul.f32 %v2666_v44, %v1869_v61 }
 0x42c   : > { %v1874_v42 = vmul.f32 %v1873_v17, %v3427_v35  ;;  %v1880_v1 = vrot.slane %v1873_v17, %v1879_v43 }
 0x42e   : > { %v1875_v19 = vsub.f32 %v1870_v41, %v1874_v42  ;;  %v1911_v22 = vmul.f32 %v1880_v1, %v3420_v3  ;;  %v1882_v23 = vmul.f32 %v1880_v1, %v3306_v13  ;;  %v1883_v24 = vmul.f32 %v1880_v1, %v3302_v29 }
 0x42f   : > { %v1884_v7 = vmul.f32 %v1880_v1, %v3304_v30  ;;  %v1885_v26 = vmul.f32 %v1880_v1, %v3313_v39  ;;  %v1886_v48 = vmul.f32 %v1880_v1, %v3315_v40  ;;  %v1887_v47 = vmul.f32 %v1880_v1, %v3320_v32 }
 0x430   : > { %v3511_v27 = vrot.slane %v1875_v19, %v1879_v43  ;;  %v1888_v35 = vmul.f32 %v1880_v1, %v3324_v0  ;;  %v1889_v62 = vmul.f32 %v1880_v1, %v3329_v34  ;;  %v1890_v3 = vmul.f32 %v1880_v1, %v3331_v8 }
 0x431   : > { %v1891_v13 = vmul.f32 %v1880_v1, %v3336_v36  ;;  %v1892_v29 = vmul.f32 %v1880_v1, %v3340_v18  ;;  %v1893_v30 = vmul.f32 %v1880_v1, %v3345_v20  ;;  %v1894_v39 = vmul.f32 %v1880_v1, %v3347_v56 }
 0x432   : > { %v1949_v40 = vadd.f32 %v3511_v27, %v1911_v22  ;;  %v1895_v32 = vmul.f32 %v1880_v1, %v3352_v25  ;;  %v1896_v28 = vmul.f32 %v1880_v1, %v3356_v15  ;;  %v1897_v0 = vmul.f32 %v1880_v1, %v3361_v45 }
 0x433   : > { %v1898_v34 = vmul.f32 %v1880_v1, %v3363_v53  ;;  %v1899_v8 = vmul.f32 %v1880_v1, %v3368_v46  ;;  %v1900_v36 = vmul.f32 %v1880_v1, %v3372_v60  ;;  %v1901_v18 = vmul.f32 %v1880_v1, %v3377_v12 }
 0x434   : > { %1981 = vst [vmem:[#allocation2 + $0xe8] sm:$0xff] %v1949_v40  ;;  %2013 = vst [vmem:[%s3115_s9 + $0xe8] sm:$0xff] %v1949_v40  ;;  %v1902_v20 = vmul.f32 %v1880_v1, %v3379_v14  ;;  %v1903_v56 = vmul.f32 %v1880_v1, %v3384_v50  ;;  %v1904_v25 = vmul.f32 %v1880_v1, %v3388_v55 }
 0x435   : > { %v1905_v15 = vmul.f32 %v1880_v1, %v3392_v9  ;;  %v1906_v45 = vmul.f32 %v1880_v1, %v3395_v63  ;;  %v3535_v53 = vmul.f32 %v1880_v1, %v3400_v5  ;;  %v3538_v46 = vmul.f32 %v1880_v1, %v3404_v33 }
 0x436   : > { %v3541_v60 = vmul.f32 %v1880_v1, %v3408_v58  ;;  %v3544_v12 = vmul.f32 %v1880_v1, %v3413_v16  ;;  %v3547_v14 = vmul.f32 %v1880_v1, %v3417_v49  ;;  %v3550_v50 = vmul.f32 %v1880_v1, %v3422_v21 }
 0x437   : > { %v1920_v55 = vadd.f32 %v3511_v27, %v1882_v23  ;;  %v1921_v9 = vadd.f32 %v3511_v27, %v1883_v24  ;;  %v1922_v63 = vadd.f32 %v3511_v27, %v1884_v7  ;;  %v1923_v5 = vadd.f32 %v3511_v27, %v1885_v26 }
 0x438   : > { %v1924_v33 = vadd.f32 %v3511_v27, %v1886_v48  ;;  %v1925_v58 = vadd.f32 %v3511_v27, %v1887_v47  ;;  %v1926_v16 = vadd.f32 %v3511_v27, %v1888_v35  ;;  %v1927_v49 = vadd.f32 %v3511_v27, %v1889_v62 }
 0x439   : > { %v1928_v21 = vadd.f32 %v3511_v27, %v1890_v3  ;;  %1952 = vst [vmem:[#allocation2] sm:$0xff] %v1920_v55  ;;  %1984 = vst [vmem:[%s3115_s9] sm:$0xff] %v1920_v55  ;;  %v1929_v31 = vadd.f32 %v3511_v27, %v1891_v13  ;;  %v1930_v4 = vadd.f32 %v3511_v27, %v1892_v29 }
 0x43a   : > { %v1931_v54 = vadd.f32 %v3511_v27, %v1893_v30  ;;  %v1932_v10 = vadd.f32 %v3511_v27, %v1894_v39  ;;  %1953 = vst [vmem:[#allocation2 + $0x8] sm:$0xff] %v1921_v9  ;;  %1954 = vst [vmem:[#allocation2 + $0x10] sm:$0xff] %v1922_v63  ;;  %v1933_v11 = vadd.f32 %v3511_v27, %v1895_v32 }
 0x43b   : > { %1955 = vst [vmem:[#allocation2 + $0x18] sm:$0xff] %v1923_v5  ;;  %1956 = vst [vmem:[#allocation2 + $0x20] sm:$0xff] %v1924_v33  ;;  %v1934_v51 = vadd.f32 %v3511_v27, %v1896_v28  ;;  %v1935_v52 = vadd.f32 %v3511_v27, %v1897_v0  ;;  %v1936_v57 = vadd.f32 %v3511_v27, %v1898_v34 }
 0x43c   : > { %1985 = vst [vmem:[%s3115_s9 + $0x8] sm:$0xff] %v1921_v9  ;;  %1986 = vst [vmem:[%s3115_s9 + $0x10] sm:$0xff] %v1922_v63  ;;  %v1937_v37 = vadd.f32 %v3511_v27, %v1899_v8  ;;  %v1938_v38 = vadd.f32 %v3511_v27, %v1900_v36  ;;  %v1939_v2 = vadd.f32 %v3511_v27, %v1901_v18 }
 0x43d   : > { %1987 = vst [vmem:[%s3115_s9 + $0x18] sm:$0xff] %v1923_v5  ;;  %1988 = vst [vmem:[%s3115_s9 + $0x20] sm:$0xff] %v1924_v33  ;;  %v1940_v6 = vadd.f32 %v3511_v27, %v1902_v20  ;;  %v1941_v59 = vadd.f32 %v3511_v27, %v1903_v56  ;;  %v1942_v61 = vadd.f32 %v3511_v27, %v1904_v25 }
 0x43e   : > { %1957 = vst [vmem:[#allocation2 + $0x28] sm:$0xff] %v1925_v58  ;;  %1958 = vst [vmem:[#allocation2 + $0x30] sm:$0xff] %v1926_v16  ;;  %v1943_v43 = vadd.f32 %v3511_v27, %v1905_v15  ;;  %v1944_v44 = vadd.f32 %v3511_v27, %v1906_v45  ;;  %v1945_v17 = vadd.f32 %v3511_v27, %v3535_v53 }
 0x43f   : > { %1959 = vst [vmem:[#allocation2 + $0x38] sm:$0xff] %v1927_v49  ;;  %1960 = vst [vmem:[#allocation2 + $0x40] sm:$0xff] %v1928_v21  ;;  %v1946_v41 = vadd.f32 %v3511_v27, %v3538_v46  ;;  %v1947_v42 = vadd.f32 %v3511_v27, %v3541_v60  ;;  %v1948_v1 = vadd.f32 %v3511_v27, %v3544_v12 }
 0x440   : > { %1989 = vst [vmem:[%s3115_s9 + $0x28] sm:$0xff] %v1925_v58  ;;  %1990 = vst [vmem:[%s3115_s9 + $0x30] sm:$0xff] %v1926_v16  ;;  %v1950_v19 = vadd.f32 %v3511_v27, %v3547_v14  ;;  %v1951_v22 = vadd.f32 %v3511_v27, %v3550_v50 }
 0x441   : > { %1991 = vst [vmem:[%s3115_s9 + $0x38] sm:$0xff] %v1927_v49  ;;  %1992 = vst [vmem:[%s3115_s9 + $0x40] sm:$0xff] %v1928_v21 }
 0x442   : > { %1961 = vst [vmem:[#allocation2 + $0x48] sm:$0xff] %v1929_v31  ;;  %1962 = vst [vmem:[#allocation2 + $0x50] sm:$0xff] %v1930_v4 }
 0x443   : > { %1963 = vst [vmem:[#allocation2 + $0x58] sm:$0xff] %v1931_v54  ;;  %1964 = vst [vmem:[#allocation2 + $0x60] sm:$0xff] %v1932_v10 }
 0x444   : > { %1993 = vst [vmem:[%s3115_s9 + $0x48] sm:$0xff] %v1929_v31  ;;  %1994 = vst [vmem:[%s3115_s9 + $0x50] sm:$0xff] %v1930_v4 }
 0x445   : > { %1995 = vst [vmem:[%s3115_s9 + $0x58] sm:$0xff] %v1931_v54  ;;  %1996 = vst [vmem:[%s3115_s9 + $0x60] sm:$0xff] %v1932_v10 }
 0x446   : > { %1965 = vst [vmem:[#allocation2 + $0x68] sm:$0xff] %v1933_v11  ;;  %1966 = vst [vmem:[#allocation2 + $0x70] sm:$0xff] %v1934_v51 }
 0x447   : > { %1967 = vst [vmem:[#allocation2 + $0x78] sm:$0xff] %v1935_v52  ;;  %1968 = vst [vmem:[#allocation2 + $0x80] sm:$0xff] %v1936_v57 }
 0x448   : > { %1997 = vst [vmem:[%s3115_s9 + $0x68] sm:$0xff] %v1933_v11  ;;  %1998 = vst [vmem:[%s3115_s9 + $0x70] sm:$0xff] %v1934_v51 }
 0x449   : > { %1999 = vst [vmem:[%s3115_s9 + $0x78] sm:$0xff] %v1935_v52  ;;  %2000 = vst [vmem:[%s3115_s9 + $0x80] sm:$0xff] %v1936_v57 }
 0x44a   : > { %1969 = vst [vmem:[#allocation2 + $0x88] sm:$0xff] %v1937_v37  ;;  %1970 = vst [vmem:[#allocation2 + $0x90] sm:$0xff] %v1938_v38 }
 0x44b   : > { %1971 = vst [vmem:[#allocation2 + $0x98] sm:$0xff] %v1939_v2  ;;  %1972 = vst [vmem:[#allocation2 + $0xa0] sm:$0xff] %v1940_v6 }
 0x44c   : > { %2001 = vst [vmem:[%s3115_s9 + $0x88] sm:$0xff] %v1937_v37  ;;  %2002 = vst [vmem:[%s3115_s9 + $0x90] sm:$0xff] %v1938_v38 }
 0x44d   : > { %2003 = vst [vmem:[%s3115_s9 + $0x98] sm:$0xff] %v1939_v2  ;;  %2004 = vst [vmem:[%s3115_s9 + $0xa0] sm:$0xff] %v1940_v6 }
 0x44e   : > { %1973 = vst [vmem:[#allocation2 + $0xa8] sm:$0xff] %v1941_v59  ;;  %1974 = vst [vmem:[#allocation2 + $0xb0] sm:$0xff] %v1942_v61 }
 0x44f   : > { %1975 = vst [vmem:[#allocation2 + $0xb8] sm:$0xff] %v1943_v43  ;;  %1976 = vst [vmem:[#allocation2 + $0xc0] sm:$0xff] %v1944_v44 }
 0x450   : > { %2005 = vst [vmem:[%s3115_s9 + $0xa8] sm:$0xff] %v1941_v59  ;;  %2006 = vst [vmem:[%s3115_s9 + $0xb0] sm:$0xff] %v1942_v61 }
 0x451   : > { %2007 = vst [vmem:[%s3115_s9 + $0xb8] sm:$0xff] %v1943_v43  ;;  %2008 = vst [vmem:[%s3115_s9 + $0xc0] sm:$0xff] %v1944_v44 }
 0x452   : > { %1977 = vst [vmem:[#allocation2 + $0xc8] sm:$0xff] %v1945_v17  ;;  %1978 = vst [vmem:[#allocation2 + $0xd0] sm:$0xff] %v1946_v41 }
 0x453   : > { %1979 = vst [vmem:[#allocation2 + $0xd8] sm:$0xff] %v1947_v42  ;;  %1980 = vst [vmem:[#allocation2 + $0xe0] sm:$0xff] %v1948_v1 }
 0x454   : > { %2009 = vst [vmem:[%s3115_s9 + $0xc8] sm:$0xff] %v1945_v17  ;;  %2010 = vst [vmem:[%s3115_s9 + $0xd0] sm:$0xff] %v1946_v41 }
 0x455   : > { %2011 = vst [vmem:[%s3115_s9 + $0xd8] sm:$0xff] %v1947_v42  ;;  %2012 = vst [vmem:[%s3115_s9 + $0xe0] sm:$0xff] %v1948_v1 }
 0x456   : > { %1982 = vst [vmem:[#allocation2 + $0xf0] sm:$0xff] %v1950_v19  ;;  %1983 = vst [vmem:[#allocation2 + $0xf8] sm:$0xff] %v1951_v22 }
 0x457   : > { %2014 = vst [vmem:[%s3115_s9 + $0xf0] sm:$0xff] %v1950_v19  ;;  %2015 = vst [vmem:[%s3115_s9 + $0xf8] sm:$0xff] %v1951_v22 }
 0x458   : > { %2766 = shalt.err (!%p2763_p11)
}
 0x459   : > { %s2767_s13 = scalar_lea.hbm %s3613_s19, 4096  ;;  %s2771_s8 = scalar_lea.hbm %s3686_s6, 8192 }
 0x45a   : > { %p2768_p4 = scmp.ne.s32.totalorder %s3613_s19, %s2767_s13  ;;  %p2772_p2 = scmp.lt.u32.totalorder %s3613_s19, %s3686_s6 }
 0x45b   : > { %p2773_p6 = scmp.lt.u32.totalorder %s2771_s8, %s2767_s13  ;;  %p2775_p5 = scmp.lt.u32.totalorder %s2767_s13, %s3613_s19 }
 0x45c   : > { %p2769_p3 = pnand %p2768_p4, %p3706_p8 }
 0x45d   : > { %p2774_p9 = por %p2773_p6, %p2772_p2 }
 0x45e   : > { %p2770_p12 = pneg %p2769_p3 }
 0x45f   : > { %p2776_p0 = por %p2775_p5, %p2774_p9 }
 0x461   : > { %p2777_p13 = pnand %p2776_p0, %p2770_p12 }
 0x463   : > { %2780 = shalt.err (!%p2777_p13)
}
 0x464   : > { %s2853_s27 = smov 128   ;;  %s2854_s17 = smov 8  }
 0x465   : > { %2522 = dma.vmem_to_hbm [thread:$0]  (%p3706_p8), %s3617_s15, 4096, %s3613_s19, %s2017_s24, %s2853_s27, %s2853_s27, %s2854_s17  }
 0x466 PF: > { %s3707_s30 = sld [smem:[#allocation15_spill]]  ;;  %s3708_s14 = sld [smem:[#allocation16_spill]] }
 0x467   : > { %p3710_p7 = scmp.ge.s32.totalorder %s2843_s26, 2 }
 0x46c   : > { %s2045_s12 = sand.u32 1, %s3707_s30   ;;  %p3709_p1 = scmp.ne.s32.totalorder %s3708_s14, 0 }
 0x46d   : > { %s2046_s20 = scalar_lea.sflag [#allocation6], %s2045_s12 }
 0x46e   : > { %p2536_p10 = pnand %p3710_p7, %p3709_p1 }
 0x470   : > { %2818 = dma.done.wait (!%p2536_p10), %s2046_s20, 4096  }
 0x471   : > { %2820 = vsyncadd (!%p2536_p10), %s2046_s20, 4294963200  ;;  %s21_s26 = sadd.s32 1, %s2843_s26   ;;  %s3711_s29 = smov %s3044_s21 }
 0x472   : > { %p18_p11 = scmp.ge.s32.totalorder %s21_s26, 4   ;;  %s3712_s21 = smov %s2827_s22 }
 0x473   : > { %s3713_s22 = smov %s2831_s23  ;;  %s3714_s23 = smov %s3711_s29 }
 0x474   : > { %s3715_s24 = smov %s2839_s25  ;;  %s3716_s25 = smov %s3718_s18 }
 0x475   :  { %20 = sbr.rel (!%p18_p11) target bundleno = 6 (0x6), region = 118 }
 0x47c   :  { %2051 = vsyncpa [#allocation5], 1 }
 0x47d   :  { %2053 = vsyncpa [#allocation5 + $0x1], 1 }
 0x47e   :  { %2054 = vsyncpa [#allocation8], 1 }
 0x47f   :  { %2055 = vsyncpa [#allocation6], 1 }
 0x480   :  { %2057 = vsyncpa [#allocation6 + $0x1], 1 }

</bundles_post_ra>
